<compile_context>
chip_gen: v6e
topology: v6e:2x2x1
jax: 0.10.0
libtpu: 0.0.40
codegen_flags: <defaults>
</compile_context>

<pallas_src>
import functools
import math

import jax
import jax.numpy as jnp
from jax.experimental import pallas as pl
from jax.experimental.pallas import tpu as pltpu

# Small-but-consistent hyperparameters (module defaults are 512/8/6/2048).
D_MODEL = 32
NHEAD = 4
NUM_LAYERS = 2
DIM_FF = 64
EPS = 1e-5

SEQ = 8
BATCH = 2

# Matmul-operand dtype.  float32 keeps exactness at toy dims; flip to
# jnp.bfloat16 when scaling toward the real module defaults (v6e/v7x MXU path).
MM_DTYPE = jnp.float32

VEC_W = 128   # lane-aligned width of the packed per-layer bias/LN vector array


# ---------------------------------------------------------------------------
# In-kernel helpers
# ---------------------------------------------------------------------------
def _layernorm(x, g, b, eps):
    # x: (N, D); g, b: (1, D) -- f32 vector path (works on v5e as well).
    mu = jnp.mean(x, axis=-1, keepdims=True)
    xc = x - mu
    var = jnp.mean(xc * xc, axis=-1, keepdims=True)
    return xc * jax.lax.rsqrt(var + eps) * g + b


# ---------------------------------------------------------------------------
# Fused transformer-encoder forward for ONE batch element (all layers + final
# LayerNorm).  Grid is over the batch; weights are VMEM-resident.
# ---------------------------------------------------------------------------
def transformer_kernel(
    x_ref,       # (S, D)            this batch element's sequence
    w_qkv_ref,   # (L*3, H, hd, D)   head-split in_proj weights (Q scale folded)
    b_qkv_ref,   # (L*3, H, 1, hd)   head-split in_proj biases  (Q scale folded)
    w_out_ref,   # (L, H, hd, D)     head-split out_proj weights
    w1_ref,      # (L, D, F)         linear1.weight.T
    w2_ref,      # (L, F, D)         linear2.weight.T
    vecs_ref,    # (L, 8, VEC_W)     [b_out, ln1_w, ln1_b, b1, b2, ln2_w, ln2_b, pad]
    norm_ref,    # (2, D)            final LayerNorm [weight; bias]
    o_ref,       # (S, D)
    *,
    nhead,
    eps,
):
    S, D = x_ref.shape
    dff = w1_ref.shape[-1]
    num_layers = w1_ref.shape[0]
    mm_dt = w1_ref.dtype

    x = x_ref[...]                                            # (S, D) f32

    for l in range(num_layers):                               # static unroll (L small)
        vl = vecs_ref[l]                                      # (8, VEC_W) f32

        # --- multi-head self-attention (post-norm, norm_first=False) ---
        xb = jnp.broadcast_to(x.astype(mm_dt), (nhead, S, D))  # (H, S, D)
        # Head-batched projections: leading-axis weight selection, contraction
        # over the full model dim, no lane-offset slicing anywhere.
        q = jnp.einsum('hsd,hfd->hsf', xb, w_qkv_ref[3 * l + 0],
                       preferred_element_type=jnp.float32) + b_qkv_ref[3 * l + 0]
        k = jnp.einsum('hsd,hfd->hsf', xb, w_qkv_ref[3 * l + 1],
                       preferred_element_type=jnp.float32) + b_qkv_ref[3 * l + 1]
        v = jnp.einsum('hsd,hfd->hsf', xb, w_qkv_ref[3 * l + 2],
                       preferred_element_type=jnp.float32) + b_qkv_ref[3 * l + 2]

        # Scores / softmax / context, batched over heads (1/sqrt(hd) already in q).
        s = jnp.einsum('hqf,hkf->hqk', q.astype(mm_dt), k.astype(mm_dt),
                       preferred_element_type=jnp.float32)      # (H, S, S)
        m = jnp.max(s, axis=-1, keepdims=True)
        e = jnp.exp(s - m)
        p = e * pl.reciprocal(jnp.sum(e, axis=-1, keepdims=True), approx=True)
        ctx = jnp.einsum('hqk,hkf->hqf', p.astype(mm_dt), v.astype(mm_dt),
                         preferred_element_type=jnp.float32)     # (H, S, hd)

        # Output projection per head (leading-axis batched), then reduce heads:
        #   concat_h(ctx_h) @ W_out.T == sum_h ctx_h @ W_out.T[rows of head h]
        attn = jnp.einsum('hqf,hfd->hqd', ctx.astype(mm_dt), w_out_ref[l],
                          preferred_element_type=jnp.float32)    # (H, S, D)
        attn = jnp.sum(attn, axis=0) + vl[0:1, :D]               # (S, D)

        # --- residual + LayerNorm 1 ---
        x = _layernorm(x + attn, vl[1:2, :D], vl[2:3, :D], eps)

        # --- feed-forward (ReLU) ---
        h1 = jnp.dot(x.astype(mm_dt), w1_ref[l],
                     preferred_element_type=jnp.float32) + vl[3:4, :dff]
        h1 = jnp.maximum(h1, 0.0)
        ff = jnp.dot(h1.astype(mm_dt), w2_ref[l],
                     preferred_element_type=jnp.float32) + vl[4:5, :D]

        # --- residual + LayerNorm 2 ---
        x = _layernorm(x + ff, vl[5:6, :D], vl[6:7, :D], eps)

    # Final encoder LayerNorm.  (D=32 -> masked 32-lane store; acceptable at
    # this size, the real fix is more tokens/lanes per call.)
    o_ref[...] = _layernorm(x, norm_ref[0:1, :], norm_ref[1:2, :], eps)
    # TODO(synk): src_mask / src_key_padding_mask (None in the reference call)
    # and train-mode dropout are not implemented (inference identity).


# ---------------------------------------------------------------------------
# Wrapper: grid over batch ("parallel" -> both TCs on v7x); weights resident.
# ---------------------------------------------------------------------------
def _resident_spec(shape):
    nd = len(shape)
    return pl.BlockSpec(shape, lambda b, _nd=nd: (0,) * _nd)


@jax.jit
def transformer_forward(x_sbd, params):
    # x_sbd: (S, B, D) -- PyTorch batch_first=False convention.
    S, B, D = x_sbd.shape
    x = jnp.transpose(x_sbd, (1, 0, 2)).reshape(B * S, D)     # rows grouped by batch
    weights = (params["w_qkv"], params["b_qkv"], params["w_out"],
               params["w1"], params["w2"], params["vecs"], params["norm"])
    out = pl.pallas_call(
        functools.partial(transformer_kernel, nhead=NHEAD, eps=EPS),
        out_shape=jax.ShapeDtypeStruct((B * S, D), jnp.float32),
        grid=(B,),
        in_specs=[pl.BlockSpec((S, D), lambda b: (b, 0))]
                 + [_resident_spec(w.shape) for w in weights],
        out_specs=pl.BlockSpec((S, D), lambda b: (b, 0)),
        compiler_params=pltpu.CompilerParams(
            dimension_semantics=("parallel",)),
    )(x, *weights)
    return jnp.transpose(out.reshape(B, S, D), (1, 0, 2))     # back to (S, B, D)


# ---------------------------------------------------------------------------
# Deterministic parameter init matching nn.Transformer._reset_parameters:
# xavier_uniform on >1-D params, biases zero (MHA in_proj bias is zero in
# torch; Linear/LN biases kept zero here), LayerNorm weight=1 / bias=0.
# Weights are pre-arranged into the head-split kernel layouts.
# ---------------------------------------------------------------------------
def _xavier_t(key, torch_shape):
    fan_out, fan_in = torch_shape           # torch nn.Linear weight is (out, in)
    bound = math.sqrt(6.0 / (fan_in + fan_out))
    return jax.random.uniform(key, torch_shape, jnp.float32, -bound, bound)


def init_params(key, d_model, nhead, num_layers, dim_ff):
    hd = d_model // nhead
    q_scale = 1.0 / math.sqrt(hd)
    assert VEC_W >= d_model and VEC_W >= dim_ff

    w_qkv_l, b_qkv_l, w_out_l, w1_l, w2_l, vecs_l = [], [], [], [], [], []
    for _ in range(num_layers):
        key, k1, k2, k3, k4 = jax.random.split(key, 5)

        # in_proj_weight: (3D, D), rows [q; k; v].  Fold 1/sqrt(hd) into the Q
        # rows; the matching Q bias is scaled below too (valid for nonzero bias).
        w_in = _xavier_t(k1, (3 * d_model, d_model))
        w_in = w_in.at[:d_model].multiply(q_scale)
        w_qkv_l.append(w_in.reshape(3, nhead, hd, d_model))     # (3, H, hd, D)

        b_qkv = jnp.zeros((3, nhead, 1, hd), jnp.float32)
        b_qkv = b_qkv.at[0].multiply(q_scale)                   # Q bias scaled
        b_qkv_l.append(b_qkv)

        # out_proj.weight: (D, D); kernel needs wout[h, f, d] = W[d, h*hd + f].
        w_o = _xavier_t(k2, (d_model, d_model))
        w_out_l.append(w_o.T.reshape(nhead, hd, d_model))       # (H, hd, D)

        w1_l.append(_xavier_t(k3, (dim_ff, d_model)).T)         # (D, F)
        w2_l.append(_xavier_t(k4, (d_model, dim_ff)).T)         # (F, D)

        # rows: 0=b_out 1=ln1_w 2=ln1_b 3=b1 4=b2 5=ln2_w 6=ln2_b 7=pad
        vecs = jnp.zeros((8, VEC_W), jnp.float32)
        vecs = vecs.at[1, :d_model].set(1.0)                    # ln1 weight = 1
        vecs = vecs.at[5, :d_model].set(1.0)                    # ln2 weight = 1
        vecs_l.append(vecs)

    return dict(
        w_qkv=jnp.stack(w_qkv_l).reshape(num_layers * 3, nhead, hd, d_model)
                .astype(MM_DTYPE),                              # (L*3, H, hd, D)
        b_qkv=jnp.stack(b_qkv_l).reshape(num_layers * 3, nhead, 1, hd),
        w_out=jnp.stack(w_out_l).astype(MM_DTYPE),              # (L, H, hd, D)
        w1=jnp.stack(w1_l).astype(MM_DTYPE),                    # (L, D, F)
        w2=jnp.stack(w2_l).astype(MM_DTYPE),                    # (L, F, D)
        vecs=jnp.stack(vecs_l),                                 # (L, 8, VEC_W)
        norm=jnp.concatenate([jnp.ones((1, d_model), jnp.float32),
                              jnp.zeros((1, d_model), jnp.float32)], axis=0),
    )


if __name__ == "__main__":
    key = jax.random.PRNGKey(0)
    kx, kp = jax.random.split(key)
    # PyTorch batch_first=False input: (seq, batch, d_model)
    x = jax.random.normal(kx, (SEQ, BATCH, D_MODEL), jnp.float32)
    params = init_params(kp, D_MODEL, NHEAD, NUM_LAYERS, DIM_FF)

    out = transformer_forward(x, params)
    jax.block_until_ready(out)
    assert out.shape == (SEQ, BATCH, D_MODEL)
    assert bool(jnp.all(jnp.isfinite(out)))
    print("KERNEL_OK")
</pallas_src>

<mosaic_0001>
module attributes {stable_mosaic.version = 11 : i64} {
  func.func @transformer_kernel(%arg0: i32, %arg1: memref<8x32xf32, #tpu.memory_space<vmem>>, %arg2: memref<6x4x8x32xf32, #tpu.memory_space<vmem>>, %arg3: memref<6x4x1x8xf32, #tpu.memory_space<vmem>>, %arg4: memref<2x4x8x32xf32, #tpu.memory_space<vmem>>, %arg5: memref<2x32x64xf32, #tpu.memory_space<vmem>>, %arg6: memref<2x64x32xf32, #tpu.memory_space<vmem>>, %arg7: memref<2x8x128xf32, #tpu.memory_space<vmem>>, %arg8: memref<2x32xf32, #tpu.memory_space<vmem>>, %arg9: memref<8x32xf32, #tpu.memory_space<vmem>>) attributes {dimension_semantics = [#tpu.dimension_semantics<parallel>], iteration_bounds = array<i64: 2>, scalar_prefetch = 0 : i64, scratch_operands = 0 : i64, tpu.core_type = #tpu.core_type<tc>, window_params = [{transform_indices = @transform_0, window_bounds = array<i64: 8, 32>}, {pipeline_mode = #tpu.pipeline_mode<synchronous>, transform_indices = @transform_1, window_bounds = array<i64: 6, 4, 8, 32>}, {pipeline_mode = #tpu.pipeline_mode<synchronous>, transform_indices = @transform_2, window_bounds = array<i64: 6, 4, 1, 8>}, {pipeline_mode = #tpu.pipeline_mode<synchronous>, transform_indices = @transform_3, window_bounds = array<i64: 2, 4, 8, 32>}, {pipeline_mode = #tpu.pipeline_mode<synchronous>, transform_indices = @transform_4, window_bounds = array<i64: 2, 32, 64>}, {pipeline_mode = #tpu.pipeline_mode<synchronous>, transform_indices = @transform_5, window_bounds = array<i64: 2, 64, 32>}, {pipeline_mode = #tpu.pipeline_mode<synchronous>, transform_indices = @transform_6, window_bounds = array<i64: 2, 8, 128>}, {pipeline_mode = #tpu.pipeline_mode<synchronous>, transform_indices = @transform_7, window_bounds = array<i64: 2, 32>}, {transform_indices = @transform_8, window_bounds = array<i64: 8, 32>}]} {
    %c0 = arith.constant 0 : index
    %c0_0 = arith.constant 0 : index
    %0 = vector.load %arg1[%c0, %c0_0] : memref<8x32xf32, #tpu.memory_space<vmem>>, vector<8x32xf32>
    %c0_1 = arith.constant 0 : index
    %c0_2 = arith.constant 0 : index
    %c0_3 = arith.constant 0 : index
    %1 = vector.load %arg7[%c0_1, %c0_2, %c0_3] : memref<2x8x128xf32, #tpu.memory_space<vmem>>, vector<1x8x128xf32>
    %2 = vector.shape_cast %1 : vector<1x8x128xf32> to vector<8x128xf32>
    %3 = vector.shape_cast %0 : vector<8x32xf32> to vector<1x8x32xf32>
    %4 = vector.broadcast %3 : vector<1x8x32xf32> to vector<4x8x32xf32>
    %c0_4 = arith.constant 0 : index
    %c0_5 = arith.constant 0 : index
    %c0_6 = arith.constant 0 : index
    %c0_7 = arith.constant 0 : index
    %5 = vector.load %arg2[%c0_4, %c0_5, %c0_6, %c0_7] : memref<6x4x8x32xf32, #tpu.memory_space<vmem>>, vector<1x4x8x32xf32>
    %6 = vector.shape_cast %5 : vector<1x4x8x32xf32> to vector<4x8x32xf32>
    "tpu.trace_start"() <{level = 10 : i32, message = "hsd,hfd->hsf"}> : () -> ()
    %cst = arith.constant dense<0.000000e+00> : vector<4x8x8xf32>
    %7 = tpu.matmul %4, %6, %cst {dimension_numbers = #tpu.dot_dimension_numbers<[2], [2], [1], [1], [0, 0, 0, 1, 1, 1], [0], [0]>} : vector<4x8x32xf32>, vector<4x8x32xf32>, vector<4x8x8xf32> -> vector<4x8x8xf32>
    "tpu.trace_stop"() : () -> ()
    %c0_8 = arith.constant 0 : index
    %c0_9 = arith.constant 0 : index
    %c0_10 = arith.constant 0 : index
    %c0_11 = arith.constant 0 : index
    %8 = vector.load %arg3[%c0_8, %c0_9, %c0_10, %c0_11] : memref<6x4x1x8xf32, #tpu.memory_space<vmem>>, vector<1x4x1x8xf32>
    %9 = vector.shape_cast %8 : vector<1x4x1x8xf32> to vector<4x1x8xf32>
    %10 = vector.broadcast %9 : vector<4x1x8xf32> to vector<4x8x8xf32>
    %11 = arith.addf %7, %10 : vector<4x8x8xf32>
    %c1 = arith.constant 1 : index
    %c0_12 = arith.constant 0 : index
    %c0_13 = arith.constant 0 : index
    %c0_14 = arith.constant 0 : index
    %12 = vector.load %arg2[%c1, %c0_12, %c0_13, %c0_14] : memref<6x4x8x32xf32, #tpu.memory_space<vmem>>, vector<1x4x8x32xf32>
    %13 = vector.shape_cast %12 : vector<1x4x8x32xf32> to vector<4x8x32xf32>
    "tpu.trace_start"() <{level = 10 : i32, message = "hsd,hfd->hsf"}> : () -> ()
    %cst_15 = arith.constant dense<0.000000e+00> : vector<4x8x8xf32>
    %14 = tpu.matmul %4, %13, %cst_15 {dimension_numbers = #tpu.dot_dimension_numbers<[2], [2], [1], [1], [0, 0, 0, 1, 1, 1], [0], [0]>} : vector<4x8x32xf32>, vector<4x8x32xf32>, vector<4x8x8xf32> -> vector<4x8x8xf32>
    "tpu.trace_stop"() : () -> ()
    %c1_16 = arith.constant 1 : index
    %c0_17 = arith.constant 0 : index
    %c0_18 = arith.constant 0 : index
    %c0_19 = arith.constant 0 : index
    %15 = vector.load %arg3[%c1_16, %c0_17, %c0_18, %c0_19] : memref<6x4x1x8xf32, #tpu.memory_space<vmem>>, vector<1x4x1x8xf32>
    %16 = vector.shape_cast %15 : vector<1x4x1x8xf32> to vector<4x1x8xf32>
    %17 = vector.broadcast %16 : vector<4x1x8xf32> to vector<4x8x8xf32>
    %18 = arith.addf %14, %17 : vector<4x8x8xf32>
    %c2 = arith.constant 2 : index
    %c0_20 = arith.constant 0 : index
    %c0_21 = arith.constant 0 : index
    %c0_22 = arith.constant 0 : index
    %19 = vector.load %arg2[%c2, %c0_20, %c0_21, %c0_22] : memref<6x4x8x32xf32, #tpu.memory_space<vmem>>, vector<1x4x8x32xf32>
    %20 = vector.shape_cast %19 : vector<1x4x8x32xf32> to vector<4x8x32xf32>
    "tpu.trace_start"() <{level = 10 : i32, message = "hsd,hfd->hsf"}> : () -> ()
    %cst_23 = arith.constant dense<0.000000e+00> : vector<4x8x8xf32>
    %21 = tpu.matmul %4, %20, %cst_23 {dimension_numbers = #tpu.dot_dimension_numbers<[2], [2], [1], [1], [0, 0, 0, 1, 1, 1], [0], [0]>} : vector<4x8x32xf32>, vector<4x8x32xf32>, vector<4x8x8xf32> -> vector<4x8x8xf32>
    "tpu.trace_stop"() : () -> ()
    %c2_24 = arith.constant 2 : index
    %c0_25 = arith.constant 0 : index
    %c0_26 = arith.constant 0 : index
    %c0_27 = arith.constant 0 : index
    %22 = vector.load %arg3[%c2_24, %c0_25, %c0_26, %c0_27] : memref<6x4x1x8xf32, #tpu.memory_space<vmem>>, vector<1x4x1x8xf32>
    %23 = vector.shape_cast %22 : vector<1x4x1x8xf32> to vector<4x1x8xf32>
    %24 = vector.broadcast %23 : vector<4x1x8xf32> to vector<4x8x8xf32>
    %25 = arith.addf %21, %24 : vector<4x8x8xf32>
    "tpu.trace_start"() <{level = 10 : i32, message = "hqf,hkf->hqk"}> : () -> ()
    %cst_28 = arith.constant dense<0.000000e+00> : vector<4x8x8xf32>
    %26 = tpu.matmul %11, %18, %cst_28 {dimension_numbers = #tpu.dot_dimension_numbers<[2], [2], [1], [1], [0, 0, 0, 1, 1, 1], [0], [0]>} : vector<4x8x8xf32>, vector<4x8x8xf32>, vector<4x8x8xf32> -> vector<4x8x8xf32>
    "tpu.trace_stop"() : () -> ()
    %cst_29 = arith.constant dense<0xFF800000> : vector<4x8xf32>
    %27 = vector.multi_reduction <maximumf>, %26, %cst_29 [2] : vector<4x8x8xf32> to vector<4x8xf32>
    %28 = vector.shape_cast %27 : vector<4x8xf32> to vector<4x8x1xf32>
    %29 = vector.broadcast %28 : vector<4x8x1xf32> to vector<4x8x8xf32>
    %30 = arith.subf %26, %29 : vector<4x8x8xf32>
    %31 = math.exp %30 : vector<4x8x8xf32>
    %cst_30 = arith.constant dense<0.000000e+00> : vector<4x8xf32>
    %32 = vector.multi_reduction <add>, %31, %cst_30 [2] : vector<4x8x8xf32> to vector<4x8xf32>
    %33 = vector.shape_cast %32 : vector<4x8xf32> to vector<4x8x1xf32>
    %34 = tpu.reciprocal %33 {approx = true} : vector<4x8x1xf32> -> vector<4x8x1xf32>
    %35 = vector.broadcast %34 : vector<4x8x1xf32> to vector<4x8x8xf32>
    %36 = arith.mulf %31, %35 : vector<4x8x8xf32>
    "tpu.trace_start"() <{level = 10 : i32, message = "hqk,hkf->hqf"}> : () -> ()
    %cst_31 = arith.constant dense<0.000000e+00> : vector<4x8x8xf32>
    %37 = tpu.matmul %36, %25, %cst_31 {dimension_numbers = #tpu.dot_dimension_numbers<[2], [1], [1], [2], [0, 0, 0, 1, 1, 2], [0], [0]>} : vector<4x8x8xf32>, vector<4x8x8xf32>, vector<4x8x8xf32> -> vector<4x8x8xf32>
    "tpu.trace_stop"() : () -> ()
    %c0_32 = arith.constant 0 : index
    %c0_33 = arith.constant 0 : index
    %c0_34 = arith.constant 0 : index
    %c0_35 = arith.constant 0 : index
    %38 = vector.load %arg4[%c0_32, %c0_33, %c0_34, %c0_35] : memref<2x4x8x32xf32, #tpu.memory_space<vmem>>, vector<1x4x8x32xf32>
    %39 = vector.shape_cast %38 : vector<1x4x8x32xf32> to vector<4x8x32xf32>
    "tpu.trace_start"() <{level = 10 : i32, message = "hqf,hfd->hqd"}> : () -> ()
    %cst_36 = arith.constant dense<0.000000e+00> : vector<4x8x32xf32>
    %40 = tpu.matmul %37, %39, %cst_36 {dimension_numbers = #tpu.dot_dimension_numbers<[2], [1], [1], [2], [0, 0, 0, 1, 1, 2], [0], [0]>} : vector<4x8x8xf32>, vector<4x8x32xf32>, vector<4x8x32xf32> -> vector<4x8x32xf32>
    "tpu.trace_stop"() : () -> ()
    %cst_37 = arith.constant dense<0.000000e+00> : vector<8x32xf32>
    %41 = vector.multi_reduction <add>, %40, %cst_37 [0] : vector<4x8x32xf32> to vector<8x32xf32>
    %42 = vector.extract_strided_slice %2 {offsets = [0, 0], sizes = [1, 32], strides = [1, 1]} : vector<8x128xf32> to vector<1x32xf32>
    %43 = vector.broadcast %42 : vector<1x32xf32> to vector<8x32xf32>
    %44 = arith.addf %41, %43 : vector<8x32xf32>
    %45 = arith.addf %0, %44 : vector<8x32xf32>
    %46 = vector.extract_strided_slice %2 {offsets = [1, 0], sizes = [1, 32], strides = [1, 1]} : vector<8x128xf32> to vector<1x32xf32>
    %47 = vector.extract_strided_slice %2 {offsets = [2, 0], sizes = [1, 32], strides = [1, 1]} : vector<8x128xf32> to vector<1x32xf32>
    %cst_38 = arith.constant dense<0.000000e+00> : vector<8xf32>
    %48 = vector.multi_reduction <add>, %45, %cst_38 [1] : vector<8x32xf32> to vector<8xf32>
    %49 = vector.shape_cast %48 : vector<8xf32> to vector<8x1xf32>
    %cst_39 = arith.constant 3.200000e+01 : f32
    %50 = vector.broadcast %cst_39 : f32 to vector<8x1xf32>
    %51 = arith.divf %49, %50 : vector<8x1xf32>
    %52 = vector.broadcast %51 : vector<8x1xf32> to vector<8x32xf32>
    %53 = arith.subf %45, %52 : vector<8x32xf32>
    %54 = arith.mulf %53, %53 : vector<8x32xf32>
    %cst_40 = arith.constant dense<0.000000e+00> : vector<8xf32>
    %55 = vector.multi_reduction <add>, %54, %cst_40 [1] : vector<8x32xf32> to vector<8xf32>
    %56 = vector.shape_cast %55 : vector<8xf32> to vector<8x1xf32>
    %cst_41 = arith.constant 3.200000e+01 : f32
    %57 = vector.broadcast %cst_41 : f32 to vector<8x1xf32>
    %58 = arith.divf %56, %57 : vector<8x1xf32>
    %cst_42 = arith.constant 9.99999974E-6 : f32
    %59 = vector.broadcast %cst_42 : f32 to vector<8x1xf32>
    %60 = arith.addf %58, %59 : vector<8x1xf32>
    %61 = math.rsqrt %60 : vector<8x1xf32>
    %62 = vector.broadcast %61 : vector<8x1xf32> to vector<8x32xf32>
    %63 = arith.mulf %53, %62 : vector<8x32xf32>
    %64 = vector.broadcast %46 : vector<1x32xf32> to vector<8x32xf32>
    %65 = arith.mulf %63, %64 : vector<8x32xf32>
    %66 = vector.broadcast %47 : vector<1x32xf32> to vector<8x32xf32>
    %67 = arith.addf %65, %66 : vector<8x32xf32>
    %c0_43 = arith.constant 0 : index
    %c0_44 = arith.constant 0 : index
    %c0_45 = arith.constant 0 : index
    %68 = vector.load %arg5[%c0_43, %c0_44, %c0_45] : memref<2x32x64xf32, #tpu.memory_space<vmem>>, vector<1x32x64xf32>
    %69 = vector.shape_cast %68 : vector<1x32x64xf32> to vector<32x64xf32>
    %cst_46 = arith.constant dense<0.000000e+00> : vector<8x64xf32>
    %70 = tpu.matmul %67, %69, %cst_46 {dimension_numbers = #tpu.dot_dimension_numbers<[1], [0], [0], [1], [0, 0, 1, 1], [], []>} : vector<8x32xf32>, vector<32x64xf32>, vector<8x64xf32> -> vector<8x64xf32>
    %71 = vector.extract_strided_slice %2 {offsets = [3, 0], sizes = [1, 64], strides = [1, 1]} : vector<8x128xf32> to vector<1x64xf32>
    %72 = vector.broadcast %71 : vector<1x64xf32> to vector<8x64xf32>
    %73 = arith.addf %70, %72 : vector<8x64xf32>
    %cst_47 = arith.constant 0.000000e+00 : f32
    %74 = vector.broadcast %cst_47 : f32 to vector<8x64xf32>
    %75 = arith.maximumf %73, %74 : vector<8x64xf32>
    %c0_48 = arith.constant 0 : index
    %c0_49 = arith.constant 0 : index
    %c0_50 = arith.constant 0 : index
    %76 = vector.load %arg6[%c0_48, %c0_49, %c0_50] : memref<2x64x32xf32, #tpu.memory_space<vmem>>, vector<1x64x32xf32>
    %77 = vector.shape_cast %76 : vector<1x64x32xf32> to vector<64x32xf32>
    %cst_51 = arith.constant dense<0.000000e+00> : vector<8x32xf32>
    %78 = tpu.matmul %75, %77, %cst_51 {dimension_numbers = #tpu.dot_dimension_numbers<[1], [0], [0], [1], [0, 0, 1, 1], [], []>} : vector<8x64xf32>, vector<64x32xf32>, vector<8x32xf32> -> vector<8x32xf32>
    %79 = vector.extract_strided_slice %2 {offsets = [4, 0], sizes = [1, 32], strides = [1, 1]} : vector<8x128xf32> to vector<1x32xf32>
    %80 = vector.broadcast %79 : vector<1x32xf32> to vector<8x32xf32>
    %81 = arith.addf %78, %80 : vector<8x32xf32>
    %82 = arith.addf %67, %81 : vector<8x32xf32>
    %83 = vector.extract_strided_slice %2 {offsets = [5, 0], sizes = [1, 32], strides = [1, 1]} : vector<8x128xf32> to vector<1x32xf32>
    %84 = vector.extract_strided_slice %2 {offsets = [6, 0], sizes = [1, 32], strides = [1, 1]} : vector<8x128xf32> to vector<1x32xf32>
    %cst_52 = arith.constant dense<0.000000e+00> : vector<8xf32>
    %85 = vector.multi_reduction <add>, %82, %cst_52 [1] : vector<8x32xf32> to vector<8xf32>
    %86 = vector.shape_cast %85 : vector<8xf32> to vector<8x1xf32>
    %cst_53 = arith.constant 3.200000e+01 : f32
    %87 = vector.broadcast %cst_53 : f32 to vector<8x1xf32>
    %88 = arith.divf %86, %87 : vector<8x1xf32>
    %89 = vector.broadcast %88 : vector<8x1xf32> to vector<8x32xf32>
    %90 = arith.subf %82, %89 : vector<8x32xf32>
    %91 = arith.mulf %90, %90 : vector<8x32xf32>
    %cst_54 = arith.constant dense<0.000000e+00> : vector<8xf32>
    %92 = vector.multi_reduction <add>, %91, %cst_54 [1] : vector<8x32xf32> to vector<8xf32>
    %93 = vector.shape_cast %92 : vector<8xf32> to vector<8x1xf32>
    %cst_55 = arith.constant 3.200000e+01 : f32
    %94 = vector.broadcast %cst_55 : f32 to vector<8x1xf32>
    %95 = arith.divf %93, %94 : vector<8x1xf32>
    %cst_56 = arith.constant 9.99999974E-6 : f32
    %96 = vector.broadcast %cst_56 : f32 to vector<8x1xf32>
    %97 = arith.addf %95, %96 : vector<8x1xf32>
    %98 = math.rsqrt %97 : vector<8x1xf32>
    %99 = vector.broadcast %98 : vector<8x1xf32> to vector<8x32xf32>
    %100 = arith.mulf %90, %99 : vector<8x32xf32>
    %101 = vector.broadcast %83 : vector<1x32xf32> to vector<8x32xf32>
    %102 = arith.mulf %100, %101 : vector<8x32xf32>
    %103 = vector.broadcast %84 : vector<1x32xf32> to vector<8x32xf32>
    %104 = arith.addf %102, %103 : vector<8x32xf32>
    %c1_57 = arith.constant 1 : index
    %c0_58 = arith.constant 0 : index
    %c0_59 = arith.constant 0 : index
    %105 = vector.load %arg7[%c1_57, %c0_58, %c0_59] : memref<2x8x128xf32, #tpu.memory_space<vmem>>, vector<1x8x128xf32>
    %106 = vector.shape_cast %105 : vector<1x8x128xf32> to vector<8x128xf32>
    %107 = vector.shape_cast %104 : vector<8x32xf32> to vector<1x8x32xf32>
    %108 = vector.broadcast %107 : vector<1x8x32xf32> to vector<4x8x32xf32>
    %c3 = arith.constant 3 : index
    %c0_60 = arith.constant 0 : index
    %c0_61 = arith.constant 0 : index
    %c0_62 = arith.constant 0 : index
    %109 = vector.load %arg2[%c3, %c0_60, %c0_61, %c0_62] : memref<6x4x8x32xf32, #tpu.memory_space<vmem>>, vector<1x4x8x32xf32>
    %110 = vector.shape_cast %109 : vector<1x4x8x32xf32> to vector<4x8x32xf32>
    "tpu.trace_start"() <{level = 10 : i32, message = "hsd,hfd->hsf"}> : () -> ()
    %cst_63 = arith.constant dense<0.000000e+00> : vector<4x8x8xf32>
    %111 = tpu.matmul %108, %110, %cst_63 {dimension_numbers = #tpu.dot_dimension_numbers<[2], [2], [1], [1], [0, 0, 0, 1, 1, 1], [0], [0]>} : vector<4x8x32xf32>, vector<4x8x32xf32>, vector<4x8x8xf32> -> vector<4x8x8xf32>
    "tpu.trace_stop"() : () -> ()
    %c3_64 = arith.constant 3 : index
    %c0_65 = arith.constant 0 : index
    %c0_66 = arith.constant 0 : index
    %c0_67 = arith.constant 0 : index
    %112 = vector.load %arg3[%c3_64, %c0_65, %c0_66, %c0_67] : memref<6x4x1x8xf32, #tpu.memory_space<vmem>>, vector<1x4x1x8xf32>
    %113 = vector.shape_cast %112 : vector<1x4x1x8xf32> to vector<4x1x8xf32>
    %114 = vector.broadcast %113 : vector<4x1x8xf32> to vector<4x8x8xf32>
    %115 = arith.addf %111, %114 : vector<4x8x8xf32>
    %c4 = arith.constant 4 : index
    %c0_68 = arith.constant 0 : index
    %c0_69 = arith.constant 0 : index
    %c0_70 = arith.constant 0 : index
    %116 = vector.load %arg2[%c4, %c0_68, %c0_69, %c0_70] : memref<6x4x8x32xf32, #tpu.memory_space<vmem>>, vector<1x4x8x32xf32>
    %117 = vector.shape_cast %116 : vector<1x4x8x32xf32> to vector<4x8x32xf32>
    "tpu.trace_start"() <{level = 10 : i32, message = "hsd,hfd->hsf"}> : () -> ()
    %cst_71 = arith.constant dense<0.000000e+00> : vector<4x8x8xf32>
    %118 = tpu.matmul %108, %117, %cst_71 {dimension_numbers = #tpu.dot_dimension_numbers<[2], [2], [1], [1], [0, 0, 0, 1, 1, 1], [0], [0]>} : vector<4x8x32xf32>, vector<4x8x32xf32>, vector<4x8x8xf32> -> vector<4x8x8xf32>
    "tpu.trace_stop"() : () -> ()
    %c4_72 = arith.constant 4 : index
    %c0_73 = arith.constant 0 : index
    %c0_74 = arith.constant 0 : index
    %c0_75 = arith.constant 0 : index
    %119 = vector.load %arg3[%c4_72, %c0_73, %c0_74, %c0_75] : memref<6x4x1x8xf32, #tpu.memory_space<vmem>>, vector<1x4x1x8xf32>
    %120 = vector.shape_cast %119 : vector<1x4x1x8xf32> to vector<4x1x8xf32>
    %121 = vector.broadcast %120 : vector<4x1x8xf32> to vector<4x8x8xf32>
    %122 = arith.addf %118, %121 : vector<4x8x8xf32>
    %c5 = arith.constant 5 : index
    %c0_76 = arith.constant 0 : index
    %c0_77 = arith.constant 0 : index
    %c0_78 = arith.constant 0 : index
    %123 = vector.load %arg2[%c5, %c0_76, %c0_77, %c0_78] : memref<6x4x8x32xf32, #tpu.memory_space<vmem>>, vector<1x4x8x32xf32>
    %124 = vector.shape_cast %123 : vector<1x4x8x32xf32> to vector<4x8x32xf32>
    "tpu.trace_start"() <{level = 10 : i32, message = "hsd,hfd->hsf"}> : () -> ()
    %cst_79 = arith.constant dense<0.000000e+00> : vector<4x8x8xf32>
    %125 = tpu.matmul %108, %124, %cst_79 {dimension_numbers = #tpu.dot_dimension_numbers<[2], [2], [1], [1], [0, 0, 0, 1, 1, 1], [0], [0]>} : vector<4x8x32xf32>, vector<4x8x32xf32>, vector<4x8x8xf32> -> vector<4x8x8xf32>
    "tpu.trace_stop"() : () -> ()
    %c5_80 = arith.constant 5 : index
    %c0_81 = arith.constant 0 : index
    %c0_82 = arith.constant 0 : index
    %c0_83 = arith.constant 0 : index
    %126 = vector.load %arg3[%c5_80, %c0_81, %c0_82, %c0_83] : memref<6x4x1x8xf32, #tpu.memory_space<vmem>>, vector<1x4x1x8xf32>
    %127 = vector.shape_cast %126 : vector<1x4x1x8xf32> to vector<4x1x8xf32>
    %128 = vector.broadcast %127 : vector<4x1x8xf32> to vector<4x8x8xf32>
    %129 = arith.addf %125, %128 : vector<4x8x8xf32>
    "tpu.trace_start"() <{level = 10 : i32, message = "hqf,hkf->hqk"}> : () -> ()
    %cst_84 = arith.constant dense<0.000000e+00> : vector<4x8x8xf32>
    %130 = tpu.matmul %115, %122, %cst_84 {dimension_numbers = #tpu.dot_dimension_numbers<[2], [2], [1], [1], [0, 0, 0, 1, 1, 1], [0], [0]>} : vector<4x8x8xf32>, vector<4x8x8xf32>, vector<4x8x8xf32> -> vector<4x8x8xf32>
    "tpu.trace_stop"() : () -> ()
    %cst_85 = arith.constant dense<0xFF800000> : vector<4x8xf32>
    %131 = vector.multi_reduction <maximumf>, %130, %cst_85 [2] : vector<4x8x8xf32> to vector<4x8xf32>
    %132 = vector.shape_cast %131 : vector<4x8xf32> to vector<4x8x1xf32>
    %133 = vector.broadcast %132 : vector<4x8x1xf32> to vector<4x8x8xf32>
    %134 = arith.subf %130, %133 : vector<4x8x8xf32>
    %135 = math.exp %134 : vector<4x8x8xf32>
    %cst_86 = arith.constant dense<0.000000e+00> : vector<4x8xf32>
    %136 = vector.multi_reduction <add>, %135, %cst_86 [2] : vector<4x8x8xf32> to vector<4x8xf32>
    %137 = vector.shape_cast %136 : vector<4x8xf32> to vector<4x8x1xf32>
    %138 = tpu.reciprocal %137 {approx = true} : vector<4x8x1xf32> -> vector<4x8x1xf32>
    %139 = vector.broadcast %138 : vector<4x8x1xf32> to vector<4x8x8xf32>
    %140 = arith.mulf %135, %139 : vector<4x8x8xf32>
    "tpu.trace_start"() <{level = 10 : i32, message = "hqk,hkf->hqf"}> : () -> ()
    %cst_87 = arith.constant dense<0.000000e+00> : vector<4x8x8xf32>
    %141 = tpu.matmul %140, %129, %cst_87 {dimension_numbers = #tpu.dot_dimension_numbers<[2], [1], [1], [2], [0, 0, 0, 1, 1, 2], [0], [0]>} : vector<4x8x8xf32>, vector<4x8x8xf32>, vector<4x8x8xf32> -> vector<4x8x8xf32>
    "tpu.trace_stop"() : () -> ()
    %c1_88 = arith.constant 1 : index
    %c0_89 = arith.constant 0 : index
    %c0_90 = arith.constant 0 : index
    %c0_91 = arith.constant 0 : index
    %142 = vector.load %arg4[%c1_88, %c0_89, %c0_90, %c0_91] : memref<2x4x8x32xf32, #tpu.memory_space<vmem>>, vector<1x4x8x32xf32>
    %143 = vector.shape_cast %142 : vector<1x4x8x32xf32> to vector<4x8x32xf32>
    "tpu.trace_start"() <{level = 10 : i32, message = "hqf,hfd->hqd"}> : () -> ()
    %cst_92 = arith.constant dense<0.000000e+00> : vector<4x8x32xf32>
    %144 = tpu.matmul %141, %143, %cst_92 {dimension_numbers = #tpu.dot_dimension_numbers<[2], [1], [1], [2], [0, 0, 0, 1, 1, 2], [0], [0]>} : vector<4x8x8xf32>, vector<4x8x32xf32>, vector<4x8x32xf32> -> vector<4x8x32xf32>
    "tpu.trace_stop"() : () -> ()
    %cst_93 = arith.constant dense<0.000000e+00> : vector<8x32xf32>
    %145 = vector.multi_reduction <add>, %144, %cst_93 [0] : vector<4x8x32xf32> to vector<8x32xf32>
    %146 = vector.extract_strided_slice %106 {offsets = [0, 0], sizes = [1, 32], strides = [1, 1]} : vector<8x128xf32> to vector<1x32xf32>
    %147 = vector.broadcast %146 : vector<1x32xf32> to vector<8x32xf32>
    %148 = arith.addf %145, %147 : vector<8x32xf32>
    %149 = arith.addf %104, %148 : vector<8x32xf32>
    %150 = vector.extract_strided_slice %106 {offsets = [1, 0], sizes = [1, 32], strides = [1, 1]} : vector<8x128xf32> to vector<1x32xf32>
    %151 = vector.extract_strided_slice %106 {offsets = [2, 0], sizes = [1, 32], strides = [1, 1]} : vector<8x128xf32> to vector<1x32xf32>
    %cst_94 = arith.constant dense<0.000000e+00> : vector<8xf32>
    %152 = vector.multi_reduction <add>, %149, %cst_94 [1] : vector<8x32xf32> to vector<8xf32>
    %153 = vector.shape_cast %152 : vector<8xf32> to vector<8x1xf32>
    %cst_95 = arith.constant 3.200000e+01 : f32
    %154 = vector.broadcast %cst_95 : f32 to vector<8x1xf32>
    %155 = arith.divf %153, %154 : vector<8x1xf32>
    %156 = vector.broadcast %155 : vector<8x1xf32> to vector<8x32xf32>
    %157 = arith.subf %149, %156 : vector<8x32xf32>
    %158 = arith.mulf %157, %157 : vector<8x32xf32>
    %cst_96 = arith.constant dense<0.000000e+00> : vector<8xf32>
    %159 = vector.multi_reduction <add>, %158, %cst_96 [1] : vector<8x32xf32> to vector<8xf32>
    %160 = vector.shape_cast %159 : vector<8xf32> to vector<8x1xf32>
    %cst_97 = arith.constant 3.200000e+01 : f32
    %161 = vector.broadcast %cst_97 : f32 to vector<8x1xf32>
    %162 = arith.divf %160, %161 : vector<8x1xf32>
    %cst_98 = arith.constant 9.99999974E-6 : f32
    %163 = vector.broadcast %cst_98 : f32 to vector<8x1xf32>
    %164 = arith.addf %162, %163 : vector<8x1xf32>
    %165 = math.rsqrt %164 : vector<8x1xf32>
    %166 = vector.broadcast %165 : vector<8x1xf32> to vector<8x32xf32>
    %167 = arith.mulf %157, %166 : vector<8x32xf32>
    %168 = vector.broadcast %150 : vector<1x32xf32> to vector<8x32xf32>
    %169 = arith.mulf %167, %168 : vector<8x32xf32>
    %170 = vector.broadcast %151 : vector<1x32xf32> to vector<8x32xf32>
    %171 = arith.addf %169, %170 : vector<8x32xf32>
    %c1_99 = arith.constant 1 : index
    %c0_100 = arith.constant 0 : index
    %c0_101 = arith.constant 0 : index
    %172 = vector.load %arg5[%c1_99, %c0_100, %c0_101] : memref<2x32x64xf32, #tpu.memory_space<vmem>>, vector<1x32x64xf32>
    %173 = vector.shape_cast %172 : vector<1x32x64xf32> to vector<32x64xf32>
    %cst_102 = arith.constant dense<0.000000e+00> : vector<8x64xf32>
    %174 = tpu.matmul %171, %173, %cst_102 {dimension_numbers = #tpu.dot_dimension_numbers<[1], [0], [0], [1], [0, 0, 1, 1], [], []>} : vector<8x32xf32>, vector<32x64xf32>, vector<8x64xf32> -> vector<8x64xf32>
    %175 = vector.extract_strided_slice %106 {offsets = [3, 0], sizes = [1, 64], strides = [1, 1]} : vector<8x128xf32> to vector<1x64xf32>
    %176 = vector.broadcast %175 : vector<1x64xf32> to vector<8x64xf32>
    %177 = arith.addf %174, %176 : vector<8x64xf32>
    %cst_103 = arith.constant 0.000000e+00 : f32
    %178 = vector.broadcast %cst_103 : f32 to vector<8x64xf32>
    %179 = arith.maximumf %177, %178 : vector<8x64xf32>
    %c1_104 = arith.constant 1 : index
    %c0_105 = arith.constant 0 : index
    %c0_106 = arith.constant 0 : index
    %180 = vector.load %arg6[%c1_104, %c0_105, %c0_106] : memref<2x64x32xf32, #tpu.memory_space<vmem>>, vector<1x64x32xf32>
    %181 = vector.shape_cast %180 : vector<1x64x32xf32> to vector<64x32xf32>
    %cst_107 = arith.constant dense<0.000000e+00> : vector<8x32xf32>
    %182 = tpu.matmul %179, %181, %cst_107 {dimension_numbers = #tpu.dot_dimension_numbers<[1], [0], [0], [1], [0, 0, 1, 1], [], []>} : vector<8x64xf32>, vector<64x32xf32>, vector<8x32xf32> -> vector<8x32xf32>
    %183 = vector.extract_strided_slice %106 {offsets = [4, 0], sizes = [1, 32], strides = [1, 1]} : vector<8x128xf32> to vector<1x32xf32>
    %184 = vector.broadcast %183 : vector<1x32xf32> to vector<8x32xf32>
    %185 = arith.addf %182, %184 : vector<8x32xf32>
    %186 = arith.addf %171, %185 : vector<8x32xf32>
    %187 = vector.extract_strided_slice %106 {offsets = [5, 0], sizes = [1, 32], strides = [1, 1]} : vector<8x128xf32> to vector<1x32xf32>
    %188 = vector.extract_strided_slice %106 {offsets = [6, 0], sizes = [1, 32], strides = [1, 1]} : vector<8x128xf32> to vector<1x32xf32>
    %cst_108 = arith.constant dense<0.000000e+00> : vector<8xf32>
    %189 = vector.multi_reduction <add>, %186, %cst_108 [1] : vector<8x32xf32> to vector<8xf32>
    %190 = vector.shape_cast %189 : vector<8xf32> to vector<8x1xf32>
    %cst_109 = arith.constant 3.200000e+01 : f32
    %191 = vector.broadcast %cst_109 : f32 to vector<8x1xf32>
    %192 = arith.divf %190, %191 : vector<8x1xf32>
    %193 = vector.broadcast %192 : vector<8x1xf32> to vector<8x32xf32>
    %194 = arith.subf %186, %193 : vector<8x32xf32>
    %195 = arith.mulf %194, %194 : vector<8x32xf32>
    %cst_110 = arith.constant dense<0.000000e+00> : vector<8xf32>
    %196 = vector.multi_reduction <add>, %195, %cst_110 [1] : vector<8x32xf32> to vector<8xf32>
    %197 = vector.shape_cast %196 : vector<8xf32> to vector<8x1xf32>
    %cst_111 = arith.constant 3.200000e+01 : f32
    %198 = vector.broadcast %cst_111 : f32 to vector<8x1xf32>
    %199 = arith.divf %197, %198 : vector<8x1xf32>
    %cst_112 = arith.constant 9.99999974E-6 : f32
    %200 = vector.broadcast %cst_112 : f32 to vector<8x1xf32>
    %201 = arith.addf %199, %200 : vector<8x1xf32>
    %202 = math.rsqrt %201 : vector<8x1xf32>
    %203 = vector.broadcast %202 : vector<8x1xf32> to vector<8x32xf32>
    %204 = arith.mulf %194, %203 : vector<8x32xf32>
    %205 = vector.broadcast %187 : vector<1x32xf32> to vector<8x32xf32>
    %206 = arith.mulf %204, %205 : vector<8x32xf32>
    %207 = vector.broadcast %188 : vector<1x32xf32> to vector<8x32xf32>
    %208 = arith.addf %206, %207 : vector<8x32xf32>
    %c0_113 = arith.constant 0 : index
    %c0_114 = arith.constant 0 : index
    %209 = vector.load %arg8[%c0_113, %c0_114] : memref<2x32xf32, #tpu.memory_space<vmem>>, vector<1x32xf32>
    %c1_115 = arith.constant 1 : index
    %c0_116 = arith.constant 0 : index
    %210 = vector.load %arg8[%c1_115, %c0_116] : memref<2x32xf32, #tpu.memory_space<vmem>>, vector<1x32xf32>
    %cst_117 = arith.constant dense<0.000000e+00> : vector<8xf32>
    %211 = vector.multi_reduction <add>, %208, %cst_117 [1] : vector<8x32xf32> to vector<8xf32>
    %212 = vector.shape_cast %211 : vector<8xf32> to vector<8x1xf32>
    %cst_118 = arith.constant 3.200000e+01 : f32
    %213 = vector.broadcast %cst_118 : f32 to vector<8x1xf32>
    %214 = arith.divf %212, %213 : vector<8x1xf32>
    %215 = vector.broadcast %214 : vector<8x1xf32> to vector<8x32xf32>
    %216 = arith.subf %208, %215 : vector<8x32xf32>
    %217 = arith.mulf %216, %216 : vector<8x32xf32>
    %cst_119 = arith.constant dense<0.000000e+00> : vector<8xf32>
    %218 = vector.multi_reduction <add>, %217, %cst_119 [1] : vector<8x32xf32> to vector<8xf32>
    %219 = vector.shape_cast %218 : vector<8xf32> to vector<8x1xf32>
    %cst_120 = arith.constant 3.200000e+01 : f32
    %220 = vector.broadcast %cst_120 : f32 to vector<8x1xf32>
    %221 = arith.divf %219, %220 : vector<8x1xf32>
    %cst_121 = arith.constant 9.99999974E-6 : f32
    %222 = vector.broadcast %cst_121 : f32 to vector<8x1xf32>
    %223 = arith.addf %221, %222 : vector<8x1xf32>
    %224 = math.rsqrt %223 : vector<8x1xf32>
    %225 = vector.broadcast %224 : vector<8x1xf32> to vector<8x32xf32>
    %226 = arith.mulf %216, %225 : vector<8x32xf32>
    %227 = vector.broadcast %209 : vector<1x32xf32> to vector<8x32xf32>
    %228 = arith.mulf %226, %227 : vector<8x32xf32>
    %229 = vector.broadcast %210 : vector<1x32xf32> to vector<8x32xf32>
    %230 = arith.addf %228, %229 : vector<8x32xf32>
    %c0_122 = arith.constant 0 : index
    %c0_123 = arith.constant 0 : index
    %231 = vector.load %arg9[%c0_122, %c0_123] : memref<8x32xf32, #tpu.memory_space<vmem>>, vector<8x32xf32>
    tpu.vector_store %arg9[%c0_122, %c0_123], %230 {strides = array<i32>} : memref<8x32xf32, #tpu.memory_space<vmem>>, vector<8x32xf32>,
    return
  }
  func.func @transform_0(%arg0: i32) -> (i32, i32) {
    %c0_i32 = arith.constant 0 : i32
    %c0_i32_0 = arith.constant 0 : i32
    return %arg0, %c0_i32 : i32, i32
  }
  func.func @transform_1(%arg0: i32) -> (i32, i32, i32, i32) {
    %c0_i32 = arith.constant 0 : i32
    %c0_i32_0 = arith.constant 0 : i32
    %c0_i32_1 = arith.constant 0 : i32
    %c0_i32_2 = arith.constant 0 : i32
    %c0_i32_3 = arith.constant 0 : i32
    return %c0_i32, %c0_i32_0, %c0_i32_1, %c0_i32_2 : i32, i32, i32, i32
  }
  func.func @transform_2(%arg0: i32) -> (i32, i32, i32, i32) {
    %c0_i32 = arith.constant 0 : i32
    %c0_i32_0 = arith.constant 0 : i32
    %c0_i32_1 = arith.constant 0 : i32
    %c0_i32_2 = arith.constant 0 : i32
    %c0_i32_3 = arith.constant 0 : i32
    return %c0_i32, %c0_i32_0, %c0_i32_1, %c0_i32_2 : i32, i32, i32, i32
  }
  func.func @transform_3(%arg0: i32) -> (i32, i32, i32, i32) {
    %c0_i32 = arith.constant 0 : i32
    %c0_i32_0 = arith.constant 0 : i32
    %c0_i32_1 = arith.constant 0 : i32
    %c0_i32_2 = arith.constant 0 : i32
    %c0_i32_3 = arith.constant 0 : i32
    return %c0_i32, %c0_i32_0, %c0_i32_1, %c0_i32_2 : i32, i32, i32, i32
  }
  func.func @transform_4(%arg0: i32) -> (i32, i32, i32) {
    %c0_i32 = arith.constant 0 : i32
    %c0_i32_0 = arith.constant 0 : i32
    %c0_i32_1 = arith.constant 0 : i32
    %c0_i32_2 = arith.constant 0 : i32
    return %c0_i32, %c0_i32_0, %c0_i32_1 : i32, i32, i32
  }
  func.func @transform_5(%arg0: i32) -> (i32, i32, i32) {
    %c0_i32 = arith.constant 0 : i32
    %c0_i32_0 = arith.constant 0 : i32
    %c0_i32_1 = arith.constant 0 : i32
    %c0_i32_2 = arith.constant 0 : i32
    return %c0_i32, %c0_i32_0, %c0_i32_1 : i32, i32, i32
  }
  func.func @transform_6(%arg0: i32) -> (i32, i32, i32) {
    %c0_i32 = arith.constant 0 : i32
    %c0_i32_0 = arith.constant 0 : i32
    %c0_i32_1 = arith.constant 0 : i32
    %c0_i32_2 = arith.constant 0 : i32
    return %c0_i32, %c0_i32_0, %c0_i32_1 : i32, i32, i32
  }
  func.func @transform_7(%arg0: i32) -> (i32, i32) {
    %c0_i32 = arith.constant 0 : i32
    %c0_i32_0 = arith.constant 0 : i32
    %c0_i32_1 = arith.constant 0 : i32
    return %c0_i32, %c0_i32_0 : i32, i32
  }
  func.func @transform_8(%arg0: i32) -> (i32, i32) {
    %c0_i32 = arith.constant 0 : i32
    %c0_i32_0 = arith.constant 0 : i32
    return %arg0, %c0_i32 : i32, i32
  }
}

</mosaic_0001>

<bundles_post_ra>
// kernel: transformer_forward.1
= control target key start
LH: loop header
LB: loop body
LE: loop exit
PB: predicated region body
PF: predicated region fallthrough
CT: control target
= control target key end

     0   :  { %13 = vsyncpa [#allocation3], 0  ;;  %s6181_s0 = inlined_call_operand.vmem [shape: f32[16,32], index: 0, kind: input, shape index: {}]   ;;  %s6182_s1 = inlined_call_operand.vmem [shape: f32[6,4,8,32], index: 1, kind: input, shape index: {}]   ;;  %s6183_s2 = inlined_call_operand.vmem [shape: f32[6,4,1,8], index: 2, kind: input, shape index: {}]   ;;  %s6184_s3 = inlined_call_operand.hbm [shape: f32[2,4,8,32], index: 3, kind: input, shape index: {}]   ;;  %s6185_s4 = inlined_call_operand.hbm [shape: f32[2,32,64], index: 4, kind: input, shape index: {}]   ;;  %s6186_s5 = inlined_call_operand.vmem [shape: f32[2,64,32], index: 5, kind: input, shape index: {}]   ;;  %s6187_s6 = inlined_call_operand.vmem [shape: f32[2,8,128], index: 6, kind: input, shape index: {}]   ;;  %s6188_s7 = inlined_call_operand.vmem [shape: f32[2,32], index: 7, kind: input, shape index: {}]   ;;  %s6189_s8 = inlined_call_operand.vmem [shape: f32[16,32], index: 8, kind: output, shape index: {}]  }
   0x1   :  { %14 = vsyncpa [#allocation5], 0  ;;  %s5519_s27 = smov 0  }
   0x2 LB: > { %s5525_s28 = sadd.s32 4294967295, %s5466_s27   ;;  %p4731_p0 = scmp.ge.s32.totalorder %s5466_s27, 1  ;;  %s5466_s27 = sphi %s5519_s27, %s20_s27  }
   0x3   : > { %p224_p1 = scmp.lt.s32.totalorder %s5466_s27, 3  ;;  %s5468_s29 = smov [#allocation2]  }
   0x4   : > { %s242_s30 = sshll.u32 %s5468_s29, 4  ;;  %p5340_p3 = scmp.eq.s32.totalorder %s5525_s28, 0  ;;  %s243_s30 = int_to_ptr.vmem [resolvable:$true] %s242_s30 }
   0x5   : > { %p5529_p2 = pnand %p4731_p0, %p224_p1  ;;  %s5469_s10 = smov [#allocation4]  }
   0x6   : > { %s255_s11 = sshll.u32 %s5469_s10, 4  ;;  %s5411_s13 = scalar_lea.vmem %s243_s30, 1024  ;;  %s256_s11 = int_to_ptr.vmem [resolvable:$true] %s255_s11 }
   0x7   : > { %p5333_p4 = pneg %p5529_p2  ;;  %p5412_p7 = scmp.ne.s32.totalorder %s243_s30, %s5411_s13 }
   0x8   : > { %p5419_p10 = scmp.lt.s32.totalorder %s243_s30, %s243_s30  ;;  %p5420_p11 = scmp.lt.s32.totalorder %s5411_s13, %s5411_s13 }
   0x9   : > { %p5538_p5 = pnand %p5340_p3, %p5333_p4 }
   0xa   : > { %p5421_p12 = por %p5420_p11, %p5419_p10 }
   0xb   : > { %p5402_p6 = pneg %p5538_p5 }
   0xd   : > { %p5414_p8 = pnand %p5412_p7, %p5402_p6 }
   0xf   : > { %p5415_p9 = pneg %p5414_p8 }
  0x11   : > { %p5422_p13 = pnand %p5421_p12, %p5415_p9 }
  0x13   : > { %5425 = shalt.err (!%p5422_p13)
}
  0x14   : > { %s5470_s14 = smov 128   ;;  %s5471_s15 = smov 8  }
  0x15   : > { %5336 = dma.hbm_to_vmem [thread:$0]  (!%p5538_p5), %s6184_s3, 1024, %s243_s30, [#allocation3], %s5470_s14, %s5470_s14, %s5471_s15  }
  0x16   : > { %s5437_s18 = scalar_lea.vmem %s256_s11, 1024  ;;  %p5445_p7 = scmp.lt.s32.totalorder %s256_s11, %s256_s11 }
  0x17   : > { %p5438_p0 = scmp.ne.s32.totalorder %s256_s11, %s5437_s18  ;;  %p5446_p8 = scmp.lt.s32.totalorder %s5437_s18, %s5437_s18 }
  0x19   : > { %p5440_p1 = pnand %p5438_p0, %p5402_p6  ;;  %p5447_p10 = por %p5446_p8, %p5445_p7 }
  0x1b   : > { %p5441_p4 = pneg %p5440_p1 }
  0x1d   : > { %p5448_p9 = pnand %p5447_p10, %p5441_p4 }
  0x1f   : > { %5451 = shalt.err (!%p5448_p9)
}
  0x20   : > { %5339 = dma.hbm_to_vmem [thread:$0]  (!%p5538_p5), %s6185_s4, 1024, %s256_s11, [#allocation5], %s5470_s14, %s5470_s14, %s5471_s15  }
  0x21   : > { %287 = sbr.rel (%p5529_p2) target bundleno = 4606 (0x11fe), region = 52 }
  0x26   : > { %5457 = dma.done.wait (%p5340_p3), [#allocation3], 1024  }
  0x27   : > { %5459 = vsyncadd (%p5340_p3), [#allocation3], 4294966272 }
  0x28   : > { %5461 = dma.done.wait (%p5340_p3), [#allocation5], 1024  }
  0x29   : > { %5463 = vsyncadd (%p5340_p3), [#allocation5], 4294966272  ;;  %p323_p6 = scmp.lt.s32.totalorder %s5525_s28, 1  ;;  %v5472_v0 = vmov 0.0   ;;  %vm5473_vm0 = vmmov 0   ;;  %vm365_vm1 = vcmask 261120  }
  0x2a   : > { %5025 = vmatprep.subr.mxu0 %v5472_v0  ;;  %5040 = vmatprep.subr.mxu1 %v5472_v0  ;;  %v333_v1 = vld [vmem:[%s6182_s1] sm:$0xff]  ;;  %v336_v2 = vld [vmem:[%s6182_s1 + $0x18] sm:$0xff]  ;;  %v334_v4 = vld [vmem:[%s6182_s1 + $0x8] sm:$0xff]  ;;  %vm1313_vm2 = vcmask 64512   ;;  %vm2381_vm3 = vcmask 523264  }
  0x2b   : > { %5027 = vmatprep.mubr.msk.f32.mxu0 %vm5473_vm0, %v5472_v0  ;;  %5042 = vmatprep.mubr.msk.f32.mxu1 %vm5473_vm0, %v5472_v0  ;;  %s6193_s28 = smov (!%p323_p6, %s5525_s28), 1  ;;  %v4753_v5 = vld [vmem:[%s6182_s1 + $0x28] sm:$0xff]  ;;  %v335_v6 = vld [vmem:[%s6182_s1 + $0x10] sm:$0xff]  ;;  %v4755_v7 = vld [vmem:[%s6182_s1 + $0x38] sm:$0xff] }
  0x2c   : > { %s4738_s21 = sshll.u32 %s6193_s28, 3  ;;  %5026 = vmatpush3.xpose.msk.msra.mxu0 %vm365_vm1, %v333_v1  ;;  %5041 = vmatpush3.xpose.msk.msra.mxu1 %vm365_vm1, %v336_v2  ;;  %v4752_v8 = vld [vmem:[%s6182_s1 + $0x20] sm:$0xff]  ;;  %v4773_v9 = vld [vmem:[%s6182_s1 + $0x48] sm:$0xff]  ;;  %v4754_v10 = vld [vmem:[%s6182_s1 + $0x30] sm:$0xff] }
  0x2d   : > { %s326_s24 = scalar_lea.vmem %s6181_s0, %s4738_s21  ;;  %5030 = vmatprep.subr.mxu0 %v5472_v0  ;;  %5050 = vmatprep.subr.mxu1 %v5472_v0  ;;  %v4775_v11 = vld [vmem:[%s6182_s1 + $0x58] sm:$0xff]  ;;  %v4772_v12 = vld [vmem:[%s6182_s1 + $0x40] sm:$0xff]  ;;  %v4774_v13 = vld [vmem:[%s6182_s1 + $0x50] sm:$0xff]  ;;  %s330_s10 = scalar_lea.vmem %s6189_s8, %s4738_s21 }
  0x2e   : > { %v5594_v3 = vld [vmem:[%s326_s24] sm:$0xff]  ;;  %v4781_v36 = vld [vmem:[%s6183_s2 + $0x9] ss:$0 sm:$0xff]  ;;  %v4780_v51 = vld [vmem:[%s6183_s2 + $0x8] ss:$0 sm:$0xff] }
  0x2f   : > { %5028 = vmatmul.mubr.msk.f32.vlgmr.msra.gmra.mxu0 %vm365_vm1, %v5594_v3  ;;  %5043 = vmatmul.mubr.msk.f32.vlgmr.msra.gmra.mxu1 %vm365_vm1, %v5594_v3  ;;  %v4761_v18 = vld [vmem:[%s6183_s2 + $0x5] ss:$0 sm:$0xff]  ;;  %v4741_v21 = vld [vmem:[%s6183_s2 + $0x1] ss:$0 sm:$0xff]  ;;  %v4763_v25 = vld [vmem:[%s6183_s2 + $0x7] ss:$0 sm:$0xff] }
  0x30   : > { %5031 = vmatpush3.xpose.msk.msra.mxu0 %vm365_vm1, %v334_v4  ;;  %5051 = vmatpush3.xpose.msk.msra.mxu1 %vm365_vm1, %v4753_v5  ;;  %v4743_v26 = vld [vmem:[%s6183_s2 + $0x3] ss:$0 sm:$0xff]  ;;  %v4760_v33 = vld [vmem:[%s6183_s2 + $0x4] ss:$0 sm:$0xff]  ;;  %v4740_v37 = vld [vmem:[%s6183_s2] ss:$0 sm:$0xff] }
  0x31   : > { %5032 = vmatprep.mubr.msk.f32.mxu0 %vm5473_vm0, %v5472_v0  ;;  %5052 = vmatprep.mubr.msk.f32.mxu1 %vm5473_vm0, %v5472_v0  ;;  %v4762_v40 = vld [vmem:[%s6183_s2 + $0x6] ss:$0 sm:$0xff]  ;;  %v4742_v46 = vld [vmem:[%s6183_s2 + $0x2] ss:$0 sm:$0xff] }
  0x32   : > { %5035 = vmatprep.subr.mxu0 %v5472_v0  ;;  %5060 = vmatprep.subr.mxu1 %v5472_v0 }
  0x33   : > { %5033 = vmatmul.mubr.msk.f32.vlgmr.msra.gmra.mxu0 %vm365_vm1, %v5594_v3  ;;  %5053 = vmatmul.mubr.msk.f32.vlgmr.msra.gmra.mxu1 %vm365_vm1, %v5594_v3 }
  0x34   : > { %5036 = vmatpush3.xpose.msk.msra.mxu0 %vm365_vm1, %v335_v6  ;;  %5061 = vmatpush3.xpose.msk.msra.mxu1 %vm365_vm1, %v4755_v7 }
  0x35   : > { %5037 = vmatprep.mubr.msk.f32.mxu0 %vm5473_vm0, %v5472_v0  ;;  %5062 = vmatprep.mubr.msk.f32.mxu1 %vm5473_vm0, %v5472_v0 }
  0x36   : > { %5045 = vmatprep.subr.mxu0 %v5472_v0  ;;  %5070 = vmatprep.subr.mxu1 %v5472_v0 }
  0x37   : > { %5038 = vmatmul.mubr.msk.f32.vlgmr.msra.gmra.mxu0 %vm365_vm1, %v5594_v3  ;;  %5063 = vmatmul.mubr.msk.f32.vlgmr.msra.gmra.mxu1 %vm365_vm1, %v5594_v3 }
  0x38   : > { %5046 = vmatpush3.xpose.msk.msra.mxu0 %vm365_vm1, %v4752_v8  ;;  %5047 = vmatprep.mubr.msk.f32.mxu0 %vm5473_vm0, %v5472_v0 }
  0x39   : > { %5055 = vmatprep.subr.mxu0 %v5472_v0  ;;  %5071 = vmatpush3.xpose.msk.msra.mxu1 %vm365_vm1, %v4773_v9 }
  0x3a   : > { %5072 = vmatprep.mubr.msk.f32.mxu1 %vm5473_vm0, %v5472_v0  ;;  %5080 = vmatprep.subr.mxu1 %v5472_v0 }
  0x3b   : > { %5048 = vmatmul.mubr.msk.f32.vlgmr.msra.gmra.mxu0 %vm365_vm1, %v5594_v3 }
  0x3c   : > { %5056 = vmatpush3.xpose.msk.msra.mxu0 %vm365_vm1, %v4754_v10  ;;  %5057 = vmatprep.mubr.msk.f32.mxu0 %vm5473_vm0, %v5472_v0 }
  0x3d   : > { %5073 = vmatmul.mubr.msk.f32.vlgmr.msra.gmra.mxu1 %vm365_vm1, %v5594_v3  ;;  %5065 = vmatprep.subr.mxu0 %v5472_v0 }
  0x3e   : > { %5082 = vmatprep.mubr.msk.f32.mxu1 %vm5473_vm0, %v5472_v0  ;;  %5081 = vmatpush3.xpose.msk.msra.mxu1 %vm365_vm1, %v4775_v11 }
  0x3f   : > { %5058 = vmatmul.mubr.msk.f32.vlgmr.msra.gmra.mxu0 %vm365_vm1, %v5594_v3  ;;  %5090 = vmatprep.subr.mxu1 %v5472_v0 }
  0x40   : > { %5067 = vmatprep.mubr.msk.f32.mxu0 %vm5473_vm0, %v5472_v0  ;;  %5066 = vmatpush3.xpose.msk.msra.mxu0 %vm365_vm1, %v4772_v12 }
  0x41   : > { %5083 = vmatmul.mubr.msk.f32.vlgmr.msra.gmra.mxu1 %vm365_vm1, %v5594_v3  ;;  %5075 = vmatprep.subr.mxu0 %v5472_v0 }
  0x42   : > { %5092 = vmatprep.mubr.msk.f32.mxu1 %vm5473_vm0, %v5472_v0 }
  0x43   : > { %5068 = vmatmul.mubr.msk.f32.vlgmr.msra.gmra.mxu0 %vm365_vm1, %v5594_v3 }
  0x44   : > { %5076 = vmatpush3.xpose.msk.msra.mxu0 %vm365_vm1, %v4774_v13  ;;  %5077 = vmatprep.mubr.msk.f32.mxu0 %vm5473_vm0, %v5472_v0 }
  0x45   : > { %5085 = vmatprep.subr.mxu0 %v5472_v0 }
  0x47   : > { %5078 = vmatmul.mubr.msk.f32.vlgmr.msra.gmra.mxu0 %vm365_vm1, %v5594_v3 }
  0x48   : > { %5087 = vmatprep.mubr.msk.f32.mxu0 %vm5473_vm0, %v5472_v0 }
  0xef   : > { %v438_v14 = vpop.f32.mrf.mxu0  ;;  %v657_v15 = vpop.f32.mrf.mxu1 }
  0xf0   : > { %v658_v31 = vadd.f32 %v4743_v26, %v657_v15  ;;  %v439_v43 = vadd.f32 %v4740_v37, %v438_v14 }
  0xf1   : > { %v5029_v16 = vpop.f32.mrf.mxu0  ;;  %v5044_v17 = vpop.f32.mrf.mxu1 }
  0xf3   : > { %v511_v19 = vpop.f32.mrf.mxu0  ;;  %v837_v20 = vpop.f32.mrf.mxu1 }
  0xf4   : > { %v838_v22 = vadd.f32 %v4761_v18, %v837_v20  ;;  %v512_v27 = vadd.f32 %v4741_v21, %v511_v19 }
  0xf5   : > { %v5034_v23 = vpop.f32.mrf.mxu0  ;;  %v5054_v24 = vpop.f32.mrf.mxu1 }
  0xf6   : > { %5091 = vmatpush3.xpose.msk.msra.mxu1 %vm1313_vm2, %v838_v22 }
  0xf7   : > { %v584_v28 = vpop.f32.mrf.mxu0  ;;  %v983_v29 = vpop.f32.mrf.mxu1  ;;  %5100 = vmatprep.subr.mxu1 %v5472_v0 }
  0xf8   : > { %v984_v30 = vadd.f32 %v4763_v25, %v983_v29  ;;  %v585_v49 = vadd.f32 %v4742_v46, %v584_v28  ;;  %v1956_v46 = vld [vmem:[#allocation2 + $0x10] sm:$0xff] }
  0xf9   : > { %v5039_v32 = vpop.f32.mrf.mxu0  ;;  %5093 = vmatmul.mubr.msk.f32.vlgmr.msra.gmra.mxu1 %vm1313_vm2, %v512_v27  ;;  %v5064_v34 = vpop.f32.mrf.mxu1 }
  0xfa   : > { %5101 = vmatpush3.xpose.msk.msra.mxu1 %vm1313_vm2, %v984_v30  ;;  %5102 = vmatprep.mubr.msk.f32.mxu1 %vm5473_vm0, %v5472_v0  ;;  %v4782_v32 = vld [vmem:[%s6183_s2 + $0xa] ss:$0 sm:$0xff] }
  0xfb   : > { %v764_v35 = vpop.f32.mrf.mxu0  ;;  %5110 = vmatprep.subr.mxu1 %v5472_v0 }
  0xfc   : > { %v765_v38 = vadd.f32 %v4760_v33, %v764_v35 }
  0xfd   : > { %v5049_v39 = vpop.f32.mrf.mxu0  ;;  %5103 = vmatmul.mubr.msk.f32.vlgmr.msra.gmra.mxu1 %vm1313_vm2, %v658_v31  ;;  %v1163_v41 = vpop.f32.mrf.mxu1 }
  0xfe   : > { %5086 = vmatpush3.xpose.msk.msra.mxu0 %vm1313_vm2, %v765_v38  ;;  %v1164_v42 = vadd.f32 %v4781_v36, %v1163_v41  ;;  %5112 = vmatprep.mubr.msk.f32.mxu1 %vm5473_vm0, %v5472_v0  ;;  %v4783_v36 = vld [vmem:[%s6183_s2 + $0xb] ss:$0 sm:$0xff] }
  0xff   : > { %v910_v44 = vpop.f32.mrf.mxu0  ;;  %5095 = vmatprep.subr.mxu0 %v5472_v0  ;;  %v5074_v45 = vpop.f32.mrf.mxu1 }
 0x100   : > { %v911_v47 = vadd.f32 %v4762_v40, %v910_v44  ;;  %5111 = vmatpush3.msra.mxu1 %v1164_v42  ;;  %v1954_v44 = vld [vmem:[#allocation2] sm:$0xff]  ;;  %v1955_v45 = vld [vmem:[#allocation2 + $0x8] sm:$0xff] }
 0x101   : > { %v5059_v48 = vpop.f32.mrf.mxu0  ;;  %5088 = vmatmul.mubr.msk.f32.vlgmr.msra.gmra.mxu0 %vm1313_vm2, %v439_v43  ;;  %5120 = vmatprep.subr.mxu1 %v5472_v0  ;;  %v5744_v50 = vpop.f32.mrf.mxu1 }
 0x102   : > { %5096 = vmatpush3.xpose.msk.msra.mxu0 %vm1313_vm2, %v911_v47  ;;  %5097 = vmatprep.mubr.msk.f32.mxu0 %vm5473_vm0, %v5472_v0  ;;  %v1310_v40 = vadd.f32 %v4783_v36, %v5744_v50 }
 0x103   : > { %5105 = vmatprep.subr.mxu0 %v5472_v0  ;;  %v1090_v52 = vpop.f32.mrf.mxu0  ;;  %v5084_v53 = vpop.f32.mrf.mxu1 }
 0x104   : > { %v1091_v54 = vadd.f32 %v4780_v51, %v1090_v52 }
 0x105   : > { %5098 = vmatmul.mubr.msk.f32.vlgmr.msra.gmra.mxu0 %vm1313_vm2, %v585_v49  ;;  %v5069_v55 = vpop.f32.mrf.mxu0  ;;  %v1957_v49 = vld [vmem:[#allocation2 + $0x18] sm:$0xff] }
 0x106   : > { %5107 = vmatprep.mubr.msk.f32.mxu0 %vm5473_vm0, %v5472_v0  ;;  %5106 = vmatpush3.msra.mxu0 %v1091_v54 }
 0x107   : > { %v1236_v56 = vpop.f32.mrf.mxu0  ;;  %5115 = vmatprep.subr.mxu0 %v5472_v0 }
 0x108   : > { %v1237_v35 = vadd.f32 %v4782_v32, %v1236_v56  ;;  %v2257_v56 = vlaneseq }
 0x109   : > { %v5079_v57 = vpop.f32.mrf.mxu0 }
 0x1b9   : > { %v1462_v58 = vpop.f32.mrf.mxu1 }
 0x1ba   : > { %v1621_v4 = vsel %vm1313_vm2, %v1462_v58, -inf }
 0x1bb   : > { %v5094_v59 = vpop.f32.mrf.mxu1 }
 0x1bd   : > { %v1614_v60 = vpop.f32.mrf.mxu1 }
 0x1be   : > { %v1627_v7 = vsel %vm1313_vm2, %v1614_v60, -inf }
 0x1bf   : > { %v5104_v61 = vpop.f32.mrf.mxu1 }
 0x1c1   : > { %v1386_v62 = vpop.f32.mrf.mxu0 }
 0x1c2   : > { %v1618_v63 = vsel %vm1313_vm2, %v1386_v62, -inf }
 0x1c3   : > { %1619 = vmax.xlane.f32.xlu0 %v1618_v63  ;;  %v5089_v1 = vpop.f32.mrf.mxu0 }
 0x1c5   : > { %v1538_v2 = vpop.f32.mrf.mxu0 }
 0x1c6   : > { %v1624_v5 = vsel %vm1313_vm2, %v1538_v2, -inf }
 0x1c7   : > { %1622 = vmax.xlane.f32.xlu0 %v1621_v4  ;;  %1625 = vmax.xlane.f32.xlu1 %v1624_v5  ;;  %v5099_v6 = vpop.f32.mrf.mxu0 }
 0x1cb   : > { %1628 = vmax.xlane.f32.xlu1 %v1627_v7 }
 0x24c   : > { %v1620_v8 = vpop.xlane.xlu0 %1619 }
 0x24d   : > { %v1630_v9 = vsub.f32 %v1386_v62, %v1620_v8 }
 0x24f   : > { %v1634_v10 = vmul.f32 1.442695, %v1630_v9 }
 0x250   : > { %v1623_v11 = vpop.xlane.xlu0 %1622  ;;  %v1626_v12 = vpop.xlane.xlu1 %1625 }
 0x251   : > { %5358 = vpow2.f32 %v1634_v10  ;;  %v1631_v13 = vsub.f32 %v1462_v58, %v1623_v11  ;;  %v1632_v14 = vsub.f32 %v1538_v2, %v1626_v12  ;;  %v5795_v58 = vshrl.u32 %v2257_v56, 7  ;;  %v5803_v2 = vld [vmem:[%s6187_s6] sm:$0xff] }
 0x253   : > { %v1636_v15 = vmul.f32 1.442695, %v1631_v13  ;;  %v1638_v16 = vmul.f32 1.442695, %v1632_v14  ;;  %v2259_v61 = vsub.s32 0, %v5795_v58 }
 0x254   : > { %v1629_v17 = vpop.xlane.xlu1 %1628 }
 0x255   : > { %5360 = vpow2.f32 %v1636_v15  ;;  %v1633_v18 = vsub.f32 %v1614_v60, %v1629_v17  ;;  %v2260_v10 = vrot.slane %v5803_v2, %v2259_v61 }
 0x256   : > { %5362 = vpow2.f32 %v1638_v16 }
 0x257   : > { %v1640_v19 = vmul.f32 1.442695, %v1633_v18 }
 0x259   : > { %5364 = vpow2.f32 %v1640_v19 }
 0x25e   : > { %v5359_v20 = vpop.eup %5358 }
 0x25f   : > { %v1642_v21 = vsel %vm1313_vm2, %v5359_v20, 0.0 }
 0x260   : > { %1643 = vadd.xlane.f32.xlu0 %v1642_v21 }
 0x262   : > { %v5361_v22 = vpop.eup %5360 }
 0x263   : > { %v5363_v23 = vpop.eup %5362  ;;  %v1645_v24 = vsel %vm1313_vm2, %v5361_v22, 0.0 }
 0x264   : > { %1646 = vadd.xlane.f32.xlu1 %v1645_v24  ;;  %v1648_v25 = vsel %vm1313_vm2, %v5363_v23, 0.0  ;;  %v2288_v24 = vld [vmem:[#allocation4 + $0x8] sm:$0xff] }
 0x265   : > { %1649 = vadd.xlane.f32.xlu0 %v1648_v25  ;;  %v2376_v25 = vld [vmem:[%s6186_s5 + $0x38] sm:$0xff] }
 0x266   : > { %v5365_v26 = vpop.eup %5364 }
 0x267   : > { %v1651_v27 = vsel %vm1313_vm2, %v5365_v26, 0.0 }
 0x268   : > { %1652 = vadd.xlane.f32.xlu1 %v1651_v27  ;;  %v2374_v27 = vld [vmem:[%s6186_s5 + $0x28] sm:$0xff] }
 0x2e9   : > { %v1644_v28 = vpop.xlane.xlu0 %1643 }
 0x2ea   : > { %5366 = vrcp.f32 %v1644_v28  ;;  %v2373_v28 = vld [vmem:[%s6186_s5 + $0x20] sm:$0xff] }
 0x2ed   : > { %v1647_v29 = vpop.xlane.xlu1 %1646 }
 0x2ee   : > { %v1650_v30 = vpop.xlane.xlu0 %1649  ;;  %5368 = vrcp.f32 %v1647_v29  ;;  %v2372_v29 = vld [vmem:[%s6186_s5 + $0x18] sm:$0xff] }
 0x2ef   : > { %5370 = vrcp.f32 %v1650_v30 }
 0x2f1   : > { %v1653_v31 = vpop.xlane.xlu1 %1652 }
 0x2f2   : > { %5372 = vrcp.f32 %v1653_v31 }
 0x2f7   : > { %v5367_v33 = vpop.eup %5366 }
 0x2f8   : > { %v1658_v34 = vmul.f32 %v5367_v33, %v5359_v20  ;;  %v2279_v33 = vsub.s32 1, %v5795_v58 }
 0x2fa   : > { %5108 = vmatmul.mubr.msk.f32.vlgmr.msra.gmra.mxu0 %vm1313_vm2, %v1658_v34  ;;  %v2284_v34 = vsub.s32 2, %v5795_v58 }
 0x2fb   : > { %v5369_v37 = vpop.eup %5368  ;;  %5116 = vmatpush3.msra.mxu0 %v1237_v35  ;;  %5117 = vmatprep.mubr.msk.f32.mxu0 %vm5473_vm0, %v5472_v0  ;;  %v2280_v35 = vrot.slane %v5803_v2, %v2279_v33 }
 0x2fc   : > { %v5371_v38 = vpop.eup %5370  ;;  %v1659_v39 = vmul.f32 %v5369_v37, %v5361_v22  ;;  %5125 = vmatprep.subr.mxu0 %v5472_v0  ;;  %v2290_v22 = vld [vmem:[#allocation4 + $0x18] sm:$0xff] }
 0x2fd   : > { %v1660_v41 = vmul.f32 %v5371_v38, %v5363_v23  ;;  %v2289_v23 = vld [vmem:[#allocation4 + $0x10] sm:$0xff]  ;;  %v2285_v38 = vrot.slane %v5803_v2, %v2284_v34 }
 0x2fe   : > { %5113 = vmatmul.mubr.msk.f32.vlgmr.msra.gmra.mxu1 %vm1313_vm2, %v1659_v39 }
 0x2ff   : > { %v5373_v42 = vpop.eup %5372  ;;  %5118 = vmatmul.mubr.msk.f32.vlgmr.msra.gmra.mxu0 %vm1313_vm2, %v1660_v41  ;;  %5121 = vmatpush3.msra.mxu1 %v1310_v40  ;;  %v2371_v41 = vld [vmem:[%s6186_s5 + $0x10] sm:$0xff] }
 0x300   : > { %5122 = vmatprep.mubr.msk.f32.mxu1 %vm5473_vm0, %v5472_v0  ;;  %v1661_v43 = vmul.f32 %v5373_v42, %v5365_v26  ;;  %5127 = vmatprep.mubr.msk.f32.mxu0 %vm5473_vm0, %v5472_v0  ;;  %v2375_v26 = vld [vmem:[%s6186_s5 + $0x30] sm:$0xff]  ;;  %v2370_v42 = vld [vmem:[%s6186_s5 + $0x8] sm:$0xff] }
 0x301   : > { %5130 = vmatprep.subr.mxu1 %v5472_v0  ;;  %5126 = vmatpush3.msra.mxu0 %v1954_v44  ;;  %v2293_v44 = vsub.s32 3, %v5795_v58 }
 0x302   : > { %5123 = vmatmul.mubr.msk.f32.vlgmr.msra.gmra.mxu1 %vm1313_vm2, %v1661_v43  ;;  %5135 = vmatprep.subr.mxu0 %v5472_v0  ;;  %v2369_v43 = vld [vmem:[%s6186_s5] sm:$0xff] }
 0x303   : > { %5132 = vmatprep.mubr.msk.f32.mxu1 %vm5473_vm0, %v5472_v0  ;;  %5131 = vmatpush3.msra.mxu1 %v1955_v45  ;;  %v2294_v45 = vrot.slane %v5803_v2, %v2293_v44 }
 0x304   : > { %5140 = vmatprep.subr.mxu1 %v5472_v0 }
 0x3ba   : > { %v1731_v47 = vpop.f32.mrf.mxu0 }
 0x3bb   : > { %5128 = vmatmul.mubr.msk.f32.vlgmr.msra.gmra.mxu0 %vm1313_vm2, %v1731_v47 }
 0x3bc   : > { %v5109_v48 = vpop.f32.mrf.mxu0  ;;  %5136 = vmatpush3.msra.mxu0 %v1956_v46  ;;  %5137 = vmatprep.mubr.msk.f32.mxu0 %vm5473_vm0, %v5472_v0 }
 0x3bd   : > { %5145 = vmatprep.subr.mxu0 %v5472_v0 }
 0x3be   : > { %v1804_v50 = vpop.f32.mrf.mxu1 }
 0x3bf   : > { %v1877_v51 = vpop.f32.mrf.mxu0  ;;  %5133 = vmatmul.mubr.msk.f32.vlgmr.msra.gmra.mxu1 %vm1313_vm2, %v1804_v50  ;;  %v2379_v50 = vsub.s32 4, %v5795_v58 }
 0x3c0   : > { %5138 = vmatmul.mubr.msk.f32.vlgmr.msra.gmra.mxu0 %vm1313_vm2, %v1877_v51  ;;  %v5114_v52 = vpop.f32.mrf.mxu1  ;;  %5141 = vmatpush3.msra.mxu1 %v1957_v49 }
 0x3c1   : > { %v5119_v53 = vpop.f32.mrf.mxu0  ;;  %5142 = vmatprep.mubr.msk.f32.mxu1 %vm5473_vm0, %v5472_v0  ;;  %5153 = vmatprep.mubr.msk.f32.mxu0 %vm5473_vm0, %v5472_v0  ;;  %v2380_v51 = vrot.slane %v5803_v2, %v2379_v50 }
 0x3c2   : > { %v1950_v54 = vpop.f32.mrf.mxu1  ;;  %5156 = vmatprep.subr.mxu1 %v5472_v0  ;;  %5146 = vmatpush3.msra.mxu0 %v2290_v22  ;;  %v4854_v22 = vld [vmem:[%s6182_s1 + $0xb8] sm:$0xff] }
 0x3c3   : > { %5143 = vmatmul.mubr.msk.f32.vlgmr.msra.gmra.mxu1 %vm1313_vm2, %v1950_v54  ;;  %5147 = vmatprep.subr.mxu0 %v5472_v0 }
 0x3c4   : > { %v5124_v55 = vpop.f32.mrf.mxu1  ;;  %5172 = vmatprep.mubr.msk.f32.mxu1 %vm5473_vm0, %v5472_v0  ;;  %5148 = vmatpush3.msra.mxu0 %v2289_v23  ;;  %v4851_v23 = vld [vmem:[%s6182_s1 + $0xa0] sm:$0xff] }
 0x3c5   : > { %5149 = vmatprep.subr.mxu0 %v5472_v0  ;;  %5157 = vmatpush3.msra.mxu1 %v2376_v25 }
 0x3c6   : > { %5150 = vmatpush3.msra.mxu0 %v2288_v24  ;;  %5158 = vmatprep.subr.mxu1 %v5472_v0  ;;  %v4853_v24 = vld [vmem:[%s6182_s1 + $0xb0] sm:$0xff] }
 0x3c7   : > { %5151 = vmatprep.subr.mxu0 %v5472_v0  ;;  %5159 = vmatpush3.msra.mxu1 %v2375_v26 }
 0x3c8   : > { %5160 = vmatprep.subr.mxu1 %v5472_v0 }
 0x3c9   : > { %5161 = vmatpush3.msra.mxu1 %v2374_v27 }
 0x3ca   : > { %5162 = vmatprep.subr.mxu1 %v5472_v0 }
 0x3cb   : > { %5163 = vmatpush3.msra.mxu1 %v2373_v28  ;;  %v4840_v28 = vld [vmem:[%s6183_s2 + $0x11] ss:$0 sm:$0xff] }
 0x3cc   : > { %5164 = vmatprep.subr.mxu1 %v5472_v0 }
 0x3cd   : > { %5165 = vmatpush3.msra.mxu1 %v2372_v29 }
 0x3ce   : > { %5166 = vmatprep.subr.mxu1 %v5472_v0 }
 0x3cf   : > { %5167 = vmatpush3.msra.mxu1 %v2371_v41  ;;  %v4822_v41 = vld [vmem:[%s6183_s2 + $0xf] ss:$0 sm:$0xff] }
 0x3d0   : > { %5168 = vmatprep.subr.mxu1 %v5472_v0 }
 0x3d1   : > { %5169 = vmatpush3.msra.mxu1 %v2370_v42 }
 0x3d2   : > { %5170 = vmatprep.subr.mxu1 %v5472_v0 }
 0x3d3   : > { %5171 = vmatpush3.msra.mxu1 %v2369_v43 }
 0x3d4   : > { %5190 = vmatprep.subr.mxu1 %v5472_v0 }
 0x47b   : > { %v2027_v57 = vpop.f32.mrf.mxu0 }
 0x47c   : > { %v2250_v62 = vsel %vm365_vm1, %v2027_v57, 0.0 }
 0x47d   : > { %v5129_v59 = vpop.f32.mrf.mxu0 }
 0x47f   : > { %v2100_v60 = vpop.f32.mrf.mxu1 }
 0x480   : > { %v2251_v63 = vsel %vm365_vm1, %v2100_v60, 0.0  ;;  %v2173_v1 = vpop.f32.mrf.mxu0 }
 0x481   : > { %v2252_v4 = vadd.f32 %v2251_v63, %v2250_v62  ;;  %v5134_v5 = vpop.f32.mrf.mxu1  ;;  %v2253_v6 = vsel %vm365_vm1, %v2173_v1, 0.0  ;;  %v4811_v1 = vld [vmem:[%s6182_s1 + $0x60] sm:$0xff] }
 0x482   : > { %v5139_v7 = vpop.f32.mrf.mxu0 }
 0x483   : > { %v2254_v8 = vadd.f32 %v2253_v6, %v2252_v4  ;;  %v2246_v9 = vpop.f32.mrf.mxu1  ;;  %v4814_v4 = vld [vmem:[%s6182_s1 + $0x78] sm:$0xff] }
 0x484   : > { %v2255_v11 = vsel %vm365_vm1, %v2246_v9, 0.0  ;;  %v2476_v9 = vsub.s32 6, %v5795_v58 }
 0x485   : > { %v2256_v12 = vadd.f32 %v2255_v11, %v2254_v8  ;;  %v5144_v13 = vpop.f32.mrf.mxu1  ;;  %v2471_v8 = vsub.s32 5, %v5795_v58 }
 0x487   : > { %v2261_v14 = vadd.f32 %v2260_v10, %v2256_v12  ;;  %v2472_v10 = vrot.slane %v5803_v2, %v2471_v8  ;;  %v2477_v12 = vrot.slane %v5803_v2, %v2476_v9  ;;  %v4813_v2 = vld [vmem:[%s6182_s1 + $0x70] sm:$0xff] }
 0x489   : > { %v2262_v15 = vadd.f32 %v2261_v14, %v5594_v3  ;;  %v2287_v3 = vld [vmem:[#allocation4] sm:$0xff] }
 0x48a   : > { %5152 = vmatpush3.msra.mxu0 %v2287_v3 }
 0x48b   : > { %v2263_v16 = vsel %vm365_vm1, %v2262_v15, 0.0  ;;  %5175 = vmatprep.subr.mxu0 %v5472_v0 }
 0x48c   : > { %2264 = vadd.xlane.f32.xlu0 %v2263_v16  ;;  %v4812_v16 = vld [vmem:[%s6182_s1 + $0x68] sm:$0xff] }
 0x515   : > { %v2265_v17 = vpop.xlane.xlu0 %2264 }
 0x516   : > { %v2267_v18 = vmul.f32 0.03125, %v2265_v17  ;;  %v4832_v17 = vld [vmem:[%s6182_s1 + $0x88] sm:$0xff] }
 0x518   : > { %v2268_v19 = vsub.f32 %v2262_v15, %v2267_v18  ;;  %v4834_v18 = vld [vmem:[%s6182_s1 + $0x98] sm:$0xff] }
 0x51a   : > { %v2269_v20 = vmul.f32 %v2268_v19, %v2268_v19 }
 0x51c   : > { %v2270_v21 = vsel %vm365_vm1, %v2269_v20, 0.0  ;;  %v4852_v20 = vld [vmem:[%s6182_s1 + $0xa8] sm:$0xff] }
 0x51d   : > { %2271 = vadd.xlane.f32.xlu1 %v2270_v21  ;;  %v4833_v21 = vld [vmem:[%s6182_s1 + $0x90] sm:$0xff] }
 0x5a6   : > { %v2272_v30 = vpop.xlane.xlu1 %2271 }
 0x5a7   : > { %v2273_v31 = vmul.f32 0.03125, %v2272_v30 }
 0x5a9   : > { %v2274_v32 = vadd.f32 1e-05, %v2273_v31  ;;  %v4820_v31 = vld [vmem:[%s6183_s2 + $0xd] ss:$0 sm:$0xff] }
 0x5ab   : > { %5374 = vrsqrt.f32 %v2274_v32 }
 0x5b8   : > { %v5375_v36 = vpop.eup %5374 }
 0x5b9   : > { %v2276_v37 = vmul.f32 %v5375_v36, %v2268_v19  ;;  %v4831_v19 = vld [vmem:[%s6182_s1 + $0x80] sm:$0xff] }
 0x5bb   : > { %v2281_v39 = vmul.f32 %v2280_v35, %v2276_v37  ;;  %v4842_v37 = vld [vmem:[%s6183_s2 + $0x13] ss:$0 sm:$0xff] }
 0x5bd   : > { %v2286_v40 = vadd.f32 %v2285_v38, %v2281_v39 }
 0x5bf   : > { %5154 = vmatmul.mubr.msk.f32.vlgmr.msra.gmra.mxu0 %vm365_vm1, %v2286_v40 }
 0x5c0   : > { %5177 = vmatprep.mubr.msk.f32.mxu0 %vm5473_vm0, %v5472_v0  ;;  %5176 = vmatpush3.xpose.msk.msra.mxu0 %vm365_vm1, %v4811_v1 }
 0x5c1   : > { %5180 = vmatprep.subr.mxu0 %v5472_v0 }
 0x67f   : > { %v2364_v46 = vpop.f32.mrf.mxu0 }
 0x680   : > { %v2365_v47 = vadd.f32 %v2364_v46, %v2294_v45  ;;  %v4839_v46 = vld [vmem:[%s6183_s2 + $0x10] ss:$0 sm:$0xff] }
 0x681   : > { %v5155_v48 = vpop.f32.mrf.mxu0 }
 0x682   : > { %v2368_v49 = vmax.f32 %v2365_v47, 0.0  ;;  %v4860_v47 = vld [vmem:[%s6183_s2 + $0x15] ss:$0 sm:$0xff] }
 0x684   : > { %5173 = vmatmul.mubr.msk.f32.vlgmr.msra.gmra.mxu1 %vm2381_vm3, %v2368_v49 }
 0x685   : > { %5192 = vmatprep.mubr.msk.f32.mxu1 %vm5473_vm0, %v5472_v0  ;;  %5191 = vmatpush3.xpose.msk.msra.mxu1 %vm365_vm1, %v4814_v4 }
 0x686   : > { %5200 = vmatprep.subr.mxu1 %v5472_v0 }
 0x744   : > { %v2451_v52 = vpop.f32.mrf.mxu1 }
 0x745   : > { %v2452_v53 = vadd.f32 %v2451_v52, %v2380_v51  ;;  %v4819_v52 = vld [vmem:[%s6183_s2 + $0xc] ss:$0 sm:$0xff] }
 0x746   : > { %v5174_v54 = vpop.f32.mrf.mxu1 }
 0x747   : > { %v2455_v55 = vadd.f32 %v2452_v53, %v2286_v40 }
 0x749   : > { %v2456_v56 = vsel %vm365_vm1, %v2455_v55, 0.0 }
 0x74a   : > { %2457 = vadd.xlane.f32.xlu0 %v2456_v56 }
 0x7d3   : > { %v2458_v57 = vpop.xlane.xlu0 %2457 }
 0x7d4   : > { %v2459_v59 = vmul.f32 0.03125, %v2458_v57  ;;  %v4841_v57 = vld [vmem:[%s6183_s2 + $0x12] ss:$0 sm:$0xff] }
 0x7d6   : > { %v2460_v60 = vsub.f32 %v2455_v55, %v2459_v59 }
 0x7d8   : > { %v2461_v62 = vmul.f32 %v2460_v60, %v2460_v60 }
 0x7da   : > { %v2462_v63 = vsel %vm365_vm1, %v2461_v62, 0.0 }
 0x7db   : > { %2463 = vadd.xlane.f32.xlu1 %v2462_v63  ;;  %v4821_v63 = vld [vmem:[%s6183_s2 + $0xe] ss:$0 sm:$0xff] }
 0x864   : > { %v2464_v5 = vpop.xlane.xlu1 %2463 }
 0x865   : > { %v2465_v6 = vmul.f32 0.03125, %v2464_v5 }
 0x867   : > { %v2466_v7 = vadd.f32 1e-05, %v2465_v6  ;;  %v4859_v6 = vld [vmem:[%s6183_s2 + $0x14] ss:$0 sm:$0xff] }
 0x869   : > { %5376 = vrsqrt.f32 %v2466_v7 }
 0x876   : > { %v5377_v11 = vpop.eup %5376 }
 0x877   : > { %v2468_v13 = vmul.f32 %v5377_v11, %v2460_v60 }
 0x879   : > { %v2473_v14 = vmul.f32 %v2472_v10, %v2468_v13 }
 0x87b   : > { %v5891_v15 = vadd.f32 %v2477_v12, %v2473_v14 }
 0x87d   : > { %5178 = vmatmul.mubr.msk.f32.vlgmr.msra.gmra.mxu0 %vm365_vm1, %v5891_v15  ;;  %5193 = vmatmul.mubr.msk.f32.vlgmr.msra.gmra.mxu1 %vm365_vm1, %v5891_v15 }
 0x87e   : > { %5181 = vmatpush3.xpose.msk.msra.mxu0 %vm365_vm1, %v4812_v16  ;;  %5201 = vmatpush3.xpose.msk.msra.mxu1 %vm365_vm1, %v4832_v17 }
 0x87f   : > { %5182 = vmatprep.mubr.msk.f32.mxu0 %vm5473_vm0, %v5472_v0  ;;  %5202 = vmatprep.mubr.msk.f32.mxu1 %vm5473_vm0, %v5472_v0 }
 0x880   : > { %5185 = vmatprep.subr.mxu0 %v5472_v0  ;;  %5210 = vmatprep.subr.mxu1 %v5472_v0 }
 0x881   : > { %5183 = vmatmul.mubr.msk.f32.vlgmr.msra.gmra.mxu0 %vm365_vm1, %v5891_v15  ;;  %5203 = vmatmul.mubr.msk.f32.vlgmr.msra.gmra.mxu1 %vm365_vm1, %v5891_v15 }
 0x882   : > { %5186 = vmatpush3.xpose.msk.msra.mxu0 %vm365_vm1, %v4813_v2  ;;  %5211 = vmatpush3.xpose.msk.msra.mxu1 %vm365_vm1, %v4834_v18 }
 0x883   : > { %5187 = vmatprep.mubr.msk.f32.mxu0 %vm5473_vm0, %v5472_v0  ;;  %5212 = vmatprep.mubr.msk.f32.mxu1 %vm5473_vm0, %v5472_v0 }
 0x884   : > { %5195 = vmatprep.subr.mxu0 %v5472_v0  ;;  %5220 = vmatprep.subr.mxu1 %v5472_v0 }
 0x885   : > { %5188 = vmatmul.mubr.msk.f32.vlgmr.msra.gmra.mxu0 %vm365_vm1, %v5891_v15  ;;  %5213 = vmatmul.mubr.msk.f32.vlgmr.msra.gmra.mxu1 %vm365_vm1, %v5891_v15 }
 0x886   : > { %5196 = vmatpush3.xpose.msk.msra.mxu0 %vm365_vm1, %v4831_v19  ;;  %5221 = vmatpush3.xpose.msk.msra.mxu1 %vm365_vm1, %v4852_v20 }
 0x887   : > { %5197 = vmatprep.mubr.msk.f32.mxu0 %vm5473_vm0, %v5472_v0  ;;  %5222 = vmatprep.mubr.msk.f32.mxu1 %vm5473_vm0, %v5472_v0 }
 0x888   : > { %5205 = vmatprep.subr.mxu0 %v5472_v0  ;;  %5230 = vmatprep.subr.mxu1 %v5472_v0 }
 0x889   : > { %5198 = vmatmul.mubr.msk.f32.vlgmr.msra.gmra.mxu0 %vm365_vm1, %v5891_v15  ;;  %5223 = vmatmul.mubr.msk.f32.vlgmr.msra.gmra.mxu1 %vm365_vm1, %v5891_v15 }
 0x88a   : > { %5206 = vmatpush3.xpose.msk.msra.mxu0 %vm365_vm1, %v4833_v21  ;;  %5231 = vmatpush3.xpose.msk.msra.mxu1 %vm365_vm1, %v4854_v22 }
 0x88b   : > { %5207 = vmatprep.mubr.msk.f32.mxu0 %vm5473_vm0, %v5472_v0  ;;  %5232 = vmatprep.mubr.msk.f32.mxu1 %vm5473_vm0, %v5472_v0 }
 0x88c   : > { %5215 = vmatprep.subr.mxu0 %v5472_v0  ;;  %5240 = vmatprep.subr.mxu1 %v5472_v0 }
 0x88d   : > { %5208 = vmatmul.mubr.msk.f32.vlgmr.msra.gmra.mxu0 %vm365_vm1, %v5891_v15  ;;  %5233 = vmatmul.mubr.msk.f32.vlgmr.msra.gmra.mxu1 %vm365_vm1, %v5891_v15 }
 0x88e   : > { %5216 = vmatpush3.xpose.msk.msra.mxu0 %vm365_vm1, %v4851_v23  ;;  %5217 = vmatprep.mubr.msk.f32.mxu0 %vm5473_vm0, %v5472_v0 }
 0x88f   : > { %5225 = vmatprep.subr.mxu0 %v5472_v0  ;;  %5242 = vmatprep.mubr.msk.f32.mxu1 %vm5473_vm0, %v5472_v0 }
 0x891   : > { %5218 = vmatmul.mubr.msk.f32.vlgmr.msra.gmra.mxu0 %vm365_vm1, %v5891_v15 }
 0x892   : > { %5226 = vmatpush3.xpose.msk.msra.mxu0 %vm365_vm1, %v4853_v24  ;;  %5227 = vmatprep.mubr.msk.f32.mxu0 %vm5473_vm0, %v5472_v0 }
 0x893   : > { %5235 = vmatprep.subr.mxu0 %v5472_v0 }
 0x895   : > { %5228 = vmatmul.mubr.msk.f32.vlgmr.msra.gmra.mxu0 %vm365_vm1, %v5891_v15 }
 0x896   : > { %5237 = vmatprep.mubr.msk.f32.mxu0 %vm5473_vm0, %v5472_v0 }
 0x93d   : > { %v2587_v3 = vpop.f32.mrf.mxu0  ;;  %v2806_v25 = vpop.f32.mrf.mxu1 }
 0x93e   : > { %v2807_v48 = vadd.f32 %v4822_v41, %v2806_v25  ;;  %v2588_v59 = vadd.f32 %v4819_v52, %v2587_v3 }
 0x93f   : > { %v5179_v26 = vpop.f32.mrf.mxu0  ;;  %v5194_v27 = vpop.f32.mrf.mxu1 }
 0x941   : > { %v2660_v29 = vpop.f32.mrf.mxu0  ;;  %v2986_v30 = vpop.f32.mrf.mxu1 }
 0x942   : > { %v2987_v32 = vadd.f32 %v4840_v28, %v2986_v30  ;;  %v2661_v38 = vadd.f32 %v4820_v31, %v2660_v29 }
 0x943   : > { %v5184_v35 = vpop.f32.mrf.mxu0  ;;  %v5204_v36 = vpop.f32.mrf.mxu1 }
 0x944   : > { %5241 = vmatpush3.xpose.msk.msra.mxu1 %vm1313_vm2, %v2987_v32 }
 0x945   : > { %v2733_v39 = vpop.f32.mrf.mxu0  ;;  %v3132_v40 = vpop.f32.mrf.mxu1  ;;  %5250 = vmatprep.subr.mxu1 %v5472_v0 }
 0x946   : > { %v3133_v42 = vadd.f32 %v4842_v37, %v3132_v40  ;;  %v2734_v7 = vadd.f32 %v4821_v63, %v2733_v39  ;;  %v4861_v63 = vld [vmem:[%s6183_s2 + $0x16] ss:$0 sm:$0xff] }
 0x947   : > { %v5189_v43 = vpop.f32.mrf.mxu0  ;;  %v5214_v45 = vpop.f32.mrf.mxu1  ;;  %5243 = vmatmul.mubr.msk.f32.vlgmr.msra.gmra.mxu1 %vm1313_vm2, %v2661_v38 }
 0x948   : > { %5251 = vmatpush3.xpose.msk.msra.mxu1 %vm1313_vm2, %v3133_v42  ;;  %5252 = vmatprep.mubr.msk.f32.mxu1 %vm5473_vm0, %v5472_v0 }
 0x949   : > { %v2913_v49 = vpop.f32.mrf.mxu0  ;;  %v3312_v51 = vpop.f32.mrf.mxu1  ;;  %5260 = vmatprep.subr.mxu1 %v5472_v0 }
 0x94a   : > { %v2914_v53 = vadd.f32 %v4839_v46, %v2913_v49  ;;  %v3313_v54 = vadd.f32 %v4860_v47, %v3312_v51 }
 0x94b   : > { %v5199_v55 = vpop.f32.mrf.mxu0  ;;  %v5224_v56 = vpop.f32.mrf.mxu1  ;;  %5253 = vmatmul.mubr.msk.f32.vlgmr.msra.gmra.mxu1 %vm1313_vm2, %v2807_v48 }
 0x94c   : > { %5236 = vmatpush3.xpose.msk.msra.mxu0 %vm1313_vm2, %v2914_v53  ;;  %5261 = vmatpush3.msra.mxu1 %v3313_v54  ;;  %v4862_v54 = vld [vmem:[%s6183_s2 + $0x17] ss:$0 sm:$0xff] }
 0x94d   : > { %v3059_v60 = vpop.f32.mrf.mxu0  ;;  %v6024_v62 = vpop.f32.mrf.mxu1  ;;  %5245 = vmatprep.subr.mxu0 %v5472_v0  ;;  %5262 = vmatprep.mubr.msk.f32.mxu1 %vm5473_vm0, %v5472_v0 }
 0x94e   : > { %v3060_v1 = vadd.f32 %v4841_v57, %v3059_v60  ;;  %5270 = vmatprep.subr.mxu1 %v5472_v0  ;;  %v3459_v57 = vadd.f32 %v4862_v54, %v6024_v62  ;;  %v4892_v54 = vld [vmem:[%s6186_s5 + $0x60] sm:$0xff] }
 0x94f   : > { %v5209_v4 = vpop.f32.mrf.mxu0  ;;  %v5234_v5 = vpop.f32.mrf.mxu1  ;;  %5238 = vmatmul.mubr.msk.f32.vlgmr.msra.gmra.mxu0 %vm1313_vm2, %v2588_v59 }
 0x950   : > { %5246 = vmatpush3.xpose.msk.msra.mxu0 %vm1313_vm2, %v3060_v1  ;;  %5247 = vmatprep.mubr.msk.f32.mxu0 %vm5473_vm0, %v5472_v0 }
 0x951   : > { %v3239_v10 = vpop.f32.mrf.mxu0  ;;  %5255 = vmatprep.subr.mxu0 %v5472_v0 }
 0x952   : > { %v3240_v11 = vadd.f32 %v4859_v6, %v3239_v10  ;;  %v4103_v10 = vld [vmem:[#allocation2 + $0x20] sm:$0xff] }
 0x953   : > { %v5219_v12 = vpop.f32.mrf.mxu0  ;;  %5248 = vmatmul.mubr.msk.f32.vlgmr.msra.gmra.mxu0 %vm1313_vm2, %v2734_v7  ;;  %v4104_v7 = vld [vmem:[#allocation2 + $0x28] sm:$0xff] }
 0x954   : > { %5256 = vmatpush3.msra.mxu0 %v3240_v11  ;;  %5257 = vmatprep.mubr.msk.f32.mxu0 %vm5473_vm0, %v5472_v0  ;;  %v4106_v11 = vld [vmem:[#allocation2 + $0x38] sm:$0xff] }
 0x955   : > { %v6044_v13 = vpop.f32.mrf.mxu0  ;;  %5265 = vmatprep.subr.mxu0 %v5472_v0 }
 0x956   : > { %v3386_v4 = vadd.f32 %v4861_v63, %v6044_v13 }
 0x957   : > { %v5229_v14 = vpop.f32.mrf.mxu0 }
 0xa07   : > { %v3610_v16 = vpop.f32.mrf.mxu1 }
 0xa08   : > { %v3769_v17 = vsel %vm1313_vm2, %v3610_v16, -inf }
 0xa09   : > { %3770 = vmax.xlane.f32.xlu1 %v3769_v17  ;;  %v5244_v2 = vpop.f32.mrf.mxu1  ;;  %v4105_v17 = vld [vmem:[#allocation2 + $0x30] sm:$0xff] }
 0xa0b   : > { %v3762_v18 = vpop.f32.mrf.mxu1 }
 0xa0c   : > { %v3775_v19 = vsel %vm1313_vm2, %v3762_v18, -inf }
 0xa0d   : > { %3776 = vmax.xlane.f32.xlu1 %v3775_v19  ;;  %v5254_v20 = vpop.f32.mrf.mxu1 }
 0xa0f   : > { %v3534_v21 = vpop.f32.mrf.mxu0 }
 0xa10   : > { %v3766_v22 = vsel %vm1313_vm2, %v3534_v21, -inf }
 0xa11   : > { %3767 = vmax.xlane.f32.xlu0 %v3766_v22  ;;  %v5239_v23 = vpop.f32.mrf.mxu0 }
 0xa13   : > { %v3686_v24 = vpop.f32.mrf.mxu0 }
 0xa14   : > { %v3772_v3 = vsel %vm1313_vm2, %v3686_v24, -inf }
 0xa15   : > { %3773 = vmax.xlane.f32.xlu0 %v3772_v3  ;;  %v5249_v25 = vpop.f32.mrf.mxu0 }
 0xa92   : > { %v3771_v26 = vpop.xlane.xlu1 %3770 }
 0xa93   : > { %v3779_v27 = vsub.f32 %v3610_v16, %v3771_v26 }
 0xa95   : > { %v3784_v28 = vmul.f32 1.442695, %v3779_v27 }
 0xa96   : > { %v3777_v29 = vpop.xlane.xlu1 %3776 }
 0xa97   : > { %5378 = vpow2.f32 %v3784_v28  ;;  %v3781_v30 = vsub.f32 %v3762_v18, %v3777_v29  ;;  %v6098_v28 = vld [vmem:[%s6187_s6 + $0x8] sm:$0xff] }
 0xa99   : > { %v3788_v31 = vmul.f32 1.442695, %v3781_v30 }
 0xa9a   : > { %v3768_v32 = vpop.xlane.xlu0 %3767 }
 0xa9b   : > { %5380 = vpow2.f32 %v3788_v31  ;;  %v3778_v35 = vsub.f32 %v3534_v21, %v3768_v32 }
 0xa9d   : > { %v3782_v36 = vmul.f32 1.442695, %v3778_v35 }
 0xa9e   : > { %v3774_v37 = vpop.xlane.xlu0 %3773 }
 0xa9f   : > { %5382 = vpow2.f32 %v3782_v36  ;;  %v3780_v38 = vsub.f32 %v3686_v24, %v3774_v37  ;;  %v4409_v36 = vrot.slane %v6098_v28, %v2259_v61  ;;  %v4437_v61 = vld [vmem:[#allocation4 + $0x28] sm:$0xff] }
 0xaa1   : > { %v3786_v39 = vmul.f32 1.442695, %v3780_v38 }
 0xaa3   : > { %5384 = vpow2.f32 %v3786_v39 }
 0xaa4   : > { %v5379_v40 = vpop.eup %5378 }
 0xaa5   : > { %v3793_v41 = vsel %vm1313_vm2, %v5379_v40, 0.0 }
 0xaa6   : > { %3794 = vadd.xlane.f32.xlu1 %v3793_v41 }
 0xaa8   : > { %v5381_v42 = vpop.eup %5380 }
 0xaa9   : > { %v3799_v43 = vsel %vm1313_vm2, %v5381_v42, 0.0 }
 0xaaa   : > { %3800 = vadd.xlane.f32.xlu1 %v3799_v43 }
 0xaac   : > { %v5383_v45 = vpop.eup %5382 }
 0xaad   : > { %v3790_v46 = vsel %vm1313_vm2, %v5383_v45, 0.0 }
 0xaae   : > { %3791 = vadd.xlane.f32.xlu0 %v3790_v46 }
 0xab0   : > { %v5385_v47 = vpop.eup %5384 }
 0xab1   : > { %v3796_v48 = vsel %vm1313_vm2, %v5385_v47, 0.0 }
 0xab2   : > { %3797 = vadd.xlane.f32.xlu0 %v3796_v48  ;;  %v4439_v48 = vld [vmem:[#allocation4 + $0x38] sm:$0xff] }
 0xb2f   : > { %v3795_v49 = vpop.xlane.xlu1 %3794 }
 0xb30   : > { %5386 = vrcp.f32 %v3795_v49  ;;  %v4438_v49 = vld [vmem:[#allocation4 + $0x30] sm:$0xff] }
 0xb33   : > { %v3801_v51 = vpop.xlane.xlu1 %3800 }
 0xb34   : > { %5388 = vrcp.f32 %v3801_v51  ;;  %v4895_v51 = vld [vmem:[%s6186_s5 + $0x78] sm:$0xff] }
 0xb37   : > { %v3792_v52 = vpop.xlane.xlu0 %3791 }
 0xb38   : > { %5390 = vrcp.f32 %v3792_v52  ;;  %v4894_v52 = vld [vmem:[%s6186_s5 + $0x70] sm:$0xff] }
 0xb3b   : > { %v3798_v53 = vpop.xlane.xlu0 %3797 }
 0xb3c   : > { %5392 = vrcp.f32 %v3798_v53  ;;  %v4893_v53 = vld [vmem:[%s6186_s5 + $0x68] sm:$0xff] }
 0xb3d   : > { %v5387_v55 = vpop.eup %5386 }
 0xb3e   : > { %v3807_v56 = vmul.f32 %v5387_v55, %v5379_v40  ;;  %v4891_v55 = vld [vmem:[%s6186_s5 + $0x58] sm:$0xff] }
 0xb40   : > { %5263 = vmatmul.mubr.msk.f32.vlgmr.msra.gmra.mxu1 %vm1313_vm2, %v3807_v56 }
 0xb41   : > { %v5389_v59 = vpop.eup %5388  ;;  %5271 = vmatpush3.msra.mxu1 %v3459_v57  ;;  %5272 = vmatprep.mubr.msk.f32.mxu1 %vm5473_vm0, %v5472_v0 }
 0xb42   : > { %v3809_v60 = vmul.f32 %v5389_v59, %v5381_v42  ;;  %5280 = vmatprep.subr.mxu1 %v5472_v0 }
 0xb44   : > { %5273 = vmatmul.mubr.msk.f32.vlgmr.msra.gmra.mxu1 %vm1313_vm2, %v3809_v60  ;;  %v4428_v60 = vrot.slane %v6098_v28, %v2279_v33  ;;  %v4889_v33 = vld [vmem:[%s6186_s5 + $0x48] sm:$0xff] }
 0xb45   : > { %v5391_v1 = vpop.eup %5390  ;;  %5282 = vmatprep.mubr.msk.f32.mxu1 %vm5473_vm0, %v5472_v0  ;;  %5281 = vmatpush3.msra.mxu1 %v4104_v7  ;;  %v4443_v7 = vrot.slane %v6098_v28, %v2293_v44 }
 0xb46   : > { %v3806_v62 = vmul.f32 %v5391_v1, %v5383_v45  ;;  %5290 = vmatprep.subr.mxu1 %v5472_v0 }
 0xb48   : > { %5258 = vmatmul.mubr.msk.f32.vlgmr.msra.gmra.mxu0 %vm1313_vm2, %v3806_v62  ;;  %v4433_v62 = vrot.slane %v6098_v28, %v2284_v34  ;;  %v4888_v34 = vld [vmem:[%s6186_s5 + $0x40] sm:$0xff] }
 0xb49   : > { %v5393_v5 = vpop.eup %5392  ;;  %5266 = vmatpush3.msra.mxu0 %v3386_v4  ;;  %5267 = vmatprep.mubr.msk.f32.mxu0 %vm5473_vm0, %v5472_v0 }
 0xb4a   : > { %v3808_v6 = vmul.f32 %v5393_v5, %v5385_v47  ;;  %5275 = vmatprep.subr.mxu0 %v5472_v0 }
 0xb4c   : > { %5268 = vmatmul.mubr.msk.f32.vlgmr.msra.gmra.mxu0 %vm1313_vm2, %v3808_v6  ;;  %v4890_v6 = vld [vmem:[%s6186_s5 + $0x50] sm:$0xff] }
 0xb4d   : > { %5277 = vmatprep.mubr.msk.f32.mxu0 %vm5473_vm0, %v5472_v0  ;;  %5276 = vmatpush3.msra.mxu0 %v4103_v10 }
 0xb4e   : > { %5285 = vmatprep.subr.mxu0 %v5472_v0 }
 0xc00   : > { %v3952_v12 = vpop.f32.mrf.mxu1 }
 0xc01   : > { %5283 = vmatmul.mubr.msk.f32.vlgmr.msra.gmra.mxu1 %vm1313_vm2, %v3952_v12 }
 0xc02   : > { %v5264_v13 = vpop.f32.mrf.mxu1  ;;  %5291 = vmatpush3.msra.mxu1 %v4106_v11  ;;  %5292 = vmatprep.mubr.msk.f32.mxu1 %vm5473_vm0, %v5472_v0 }
 0xc03   : > { %5306 = vmatprep.subr.mxu1 %v5472_v0 }
 0xc04   : > { %v4098_v14 = vpop.f32.mrf.mxu1 }
 0xc05   : > { %5293 = vmatmul.mubr.msk.f32.vlgmr.msra.gmra.mxu1 %vm1313_vm2, %v4098_v14  ;;  %v4530_v14 = vrot.slane %v6098_v28, %v2379_v50  ;;  %v4621_v50 = vrot.slane %v6098_v28, %v2471_v8 }
 0xc06   : > { %v5274_v16 = vpop.f32.mrf.mxu1  ;;  %5322 = vmatprep.mubr.msk.f32.mxu1 %vm5473_vm0, %v5472_v0  ;;  %5307 = vmatpush3.msra.mxu1 %v4895_v51 }
 0xc07   : > { %5308 = vmatprep.subr.mxu1 %v5472_v0 }
 0xc08   : > { %v3879_v2 = vpop.f32.mrf.mxu0  ;;  %5309 = vmatpush3.msra.mxu1 %v4894_v52 }
 0xc09   : > { %5278 = vmatmul.mubr.msk.f32.vlgmr.msra.gmra.mxu0 %vm1313_vm2, %v3879_v2  ;;  %5310 = vmatprep.subr.mxu1 %v5472_v0 }
 0xc0a   : > { %v5259_v18 = vpop.f32.mrf.mxu0  ;;  %5286 = vmatpush3.msra.mxu0 %v4105_v17  ;;  %5287 = vmatprep.mubr.msk.f32.mxu0 %vm5473_vm0, %v5472_v0 }
 0xc0b   : > { %5295 = vmatprep.subr.mxu0 %v5472_v0  ;;  %5311 = vmatpush3.msra.mxu1 %v4893_v53 }
 0xc0c   : > { %v4025_v19 = vpop.f32.mrf.mxu0  ;;  %5312 = vmatprep.subr.mxu1 %v5472_v0 }
 0xc0d   : > { %5288 = vmatmul.mubr.msk.f32.vlgmr.msra.gmra.mxu0 %vm1313_vm2, %v4025_v19  ;;  %5313 = vmatpush3.msra.mxu1 %v4892_v54 }
 0xc0e   : > { %v5269_v20 = vpop.f32.mrf.mxu0  ;;  %5303 = vmatprep.mubr.msk.f32.mxu0 %vm5473_vm0, %v5472_v0  ;;  %5296 = vmatpush3.msra.mxu0 %v4439_v48 }
 0xc0f   : > { %5297 = vmatprep.subr.mxu0 %v5472_v0  ;;  %5314 = vmatprep.subr.mxu1 %v5472_v0 }
 0xc10   : > { %5298 = vmatpush3.msra.mxu0 %v4438_v49  ;;  %5315 = vmatpush3.msra.mxu1 %v4891_v55 }
 0xc11   : > { %5299 = vmatprep.subr.mxu0 %v5472_v0  ;;  %5316 = vmatprep.subr.mxu1 %v5472_v0 }
 0xc12   : > { %5300 = vmatpush3.msra.mxu0 %v4437_v61  ;;  %5317 = vmatpush3.msra.mxu1 %v4890_v6 }
 0xc13   : > { %5301 = vmatprep.subr.mxu0 %v5472_v0  ;;  %5318 = vmatprep.subr.mxu1 %v5472_v0 }
 0xc14   : > { %5319 = vmatpush3.msra.mxu1 %v4889_v33 }
 0xc15   : > { %5320 = vmatprep.subr.mxu1 %v5472_v0 }
 0xc16   : > { %5321 = vmatpush3.msra.mxu1 %v4888_v34 }
 0xcc1   : > { %v4249_v21 = vpop.f32.mrf.mxu1 }
 0xcc2   : > { %v4400_v27 = vsel %vm365_vm1, %v4249_v21, 0.0 }
 0xcc3   : > { %v5284_v22 = vpop.f32.mrf.mxu1 }
 0xcc5   : > { %v4395_v23 = vpop.f32.mrf.mxu1 }
 0xcc6   : > { %v4404_v37 = vsel %vm365_vm1, %v4395_v23, 0.0 }
 0xcc7   : > { %v5294_v24 = vpop.f32.mrf.mxu1 }
 0xcc9   : > { %v4176_v3 = vpop.f32.mrf.mxu0 }
 0xcca   : > { %v4399_v25 = vsel %vm365_vm1, %v4176_v3, 0.0 }
 0xccb   : > { %v5279_v26 = vpop.f32.mrf.mxu0  ;;  %v4401_v29 = vadd.f32 %v4400_v27, %v4399_v25  ;;  %v4626_v27 = vrot.slane %v6098_v28, %v2476_v9  ;;  %v4897_v9 = vld [vmem:[%s6188_s7] ss:$0 sm:$0xff] }
 0xccd   : > { %v4322_v30 = vpop.f32.mrf.mxu0 }
 0xcce   : > { %v4402_v31 = vsel %vm365_vm1, %v4322_v30, 0.0 }
 0xccf   : > { %v4403_v32 = vadd.f32 %v4402_v31, %v4401_v29  ;;  %v5289_v35 = vpop.f32.mrf.mxu0 }
 0xcd1   : > { %v4405_v38 = vadd.f32 %v4404_v37, %v4403_v32 }
 0xcd3   : > { %v4410_v39 = vadd.f32 %v4409_v36, %v4405_v38 }
 0xcd5   : > { %v4411_v40 = vadd.f32 %v4410_v39, %v5891_v15  ;;  %v4436_v15 = vld [vmem:[#allocation4 + $0x20] sm:$0xff] }
 0xcd6   : > { %5302 = vmatpush3.msra.mxu0 %v4436_v15 }
 0xcd7   : > { %v4412_v41 = vsel %vm365_vm1, %v4411_v40, 0.0 }
 0xcd8   : > { %4413 = vadd.xlane.f32.xlu0 %v4412_v41  ;;  %v4898_v41 = vld [vmem:[%s6188_s7 + $0x1] ss:$0 sm:$0xff] }
 0xd61   : > { %v4414_v42 = vpop.xlane.xlu0 %4413 }
 0xd62   : > { %v4415_v43 = vmul.f32 0.03125, %v4414_v42 }
 0xd64   : > { %v4416_v45 = vsub.f32 %v4411_v40, %v4415_v43 }
 0xd66   : > { %v4417_v46 = vmul.f32 %v4416_v45, %v4416_v45 }
 0xd68   : > { %v4418_v47 = vsel %vm365_vm1, %v4417_v46, 0.0 }
 0xd69   : > { %4419 = vadd.xlane.f32.xlu1 %v4418_v47 }
 0xdf2   : > { %v4420_v56 = vpop.xlane.xlu1 %4419 }
 0xdf3   : > { %v4421_v57 = vmul.f32 0.03125, %v4420_v56 }
 0xdf5   : > { %v4422_v59 = vadd.f32 1e-05, %v4421_v57 }
 0xdf7   : > { %5394 = vrsqrt.f32 %v4422_v59 }
 0xe04   : > { %v5395_v63 = vpop.eup %5394 }
 0xe05   : > { %v4424_v1 = vmul.f32 %v5395_v63, %v4416_v45 }
 0xe07   : > { %v4429_v4 = vmul.f32 %v4428_v60, %v4424_v1 }
 0xe09   : > { %v4434_v5 = vadd.f32 %v4433_v62, %v4429_v4 }
 0xe0b   : > { %5304 = vmatmul.mubr.msk.f32.vlgmr.msra.gmra.mxu0 %vm365_vm1, %v4434_v5 }
 0xecb   : > { %v4513_v10 = vpop.f32.mrf.mxu0 }
 0xecc   : > { %v4514_v11 = vadd.f32 %v4513_v10, %v4443_v7 }
 0xecd   : > { %v5305_v12 = vpop.f32.mrf.mxu0 }
 0xece   : > { %v4517_v13 = vmax.f32 %v4514_v11, 0.0 }
 0xed0   : > { %5323 = vmatmul.mubr.msk.f32.vlgmr.msra.gmra.mxu1 %vm2381_vm3, %v4517_v13 }
 0xf90   : > { %v4600_v16 = vpop.f32.mrf.mxu1 }
 0xf91   : > { %v4601_v17 = vadd.f32 %v4600_v16, %v4530_v14 }
 0xf92   : > { %v5324_v2 = vpop.f32.mrf.mxu1 }
 0xf93   : > { %v4604_v18 = vadd.f32 %v4601_v17, %v4434_v5 }
 0xf95   : > { %v4605_v0 = vsel %vm365_vm1, %v4604_v18, 0.0 }
 0xf96   : > { %4606 = vadd.xlane.f32.xlu0 %v4605_v0 }
0x101f   : > { %v4607_v19 = vpop.xlane.xlu0 %4606 }
0x1020   : > { %v4608_v20 = vmul.f32 0.03125, %v4607_v19 }
0x1022   : > { %v4609_v44 = vsub.f32 %v4604_v18, %v4608_v20 }
0x1024   : > { %v4610_v21 = vmul.f32 %v4609_v44, %v4609_v44 }
0x1026   : > { %v4611_v22 = vsel %vm365_vm1, %v4610_v21, 0.0 }
0x1027   : > { %4612 = vadd.xlane.f32.xlu1 %v4611_v22 }
0x10b0   : > { %v4613_v23 = vpop.xlane.xlu1 %4612 }
0x10b1   : > { %v4614_v24 = vmul.f32 0.03125, %v4613_v23 }
0x10b3   : > { %v4615_v3 = vadd.f32 1e-05, %v4614_v24 }
0x10b5   : > { %5396 = vrsqrt.f32 %v4615_v3 }
0x10c2   : > { %v5397_v25 = vpop.eup %5396 }
0x10c3   : > { %v4617_v26 = vmul.f32 %v5397_v25, %v4609_v44 }
0x10c5   : > { %v4622_v29 = vmul.f32 %v4621_v50, %v4617_v26 }
0x10c7   : > { %v4627_v30 = vadd.f32 %v4626_v27, %v4622_v29 }
0x10c9   : > { %v4630_v31 = vsel %vm365_vm1, %v4627_v30, 0.0 }
0x10ca   : > { %4631 = vadd.xlane.f32.xlu0 %v4630_v31 }
0x1153   : > { %v4632_v32 = vpop.xlane.xlu0 %4631 }
0x1154   : > { %v4633_v35 = vmul.f32 0.03125, %v4632_v32 }
0x1156   : > { %v4634_v36 = vsub.f32 %v4627_v30, %v4633_v35 }
0x1158   : > { %v4635_v37 = vmul.f32 %v4634_v36, %v4634_v36 }
0x115a   : > { %v4636_v38 = vsel %vm365_vm1, %v4635_v37, 0.0 }
0x115b   : > { %4637 = vadd.xlane.f32.xlu1 %v4636_v38 }
0x11e4   : > { %v4638_v8 = vpop.xlane.xlu1 %4637 }
0x11e5   : > { %v4639_v39 = vmul.f32 0.03125, %v4638_v8 }
0x11e7   : > { %v4640_v40 = vadd.f32 1e-05, %v4639_v39 }
0x11e9   : > { %5398 = vrsqrt.f32 %v4640_v40 }
0x11f6   : > { %v5399_v58 = vpop.eup %5398 }
0x11f7   : > { %v4642_v28 = vmul.f32 %v5399_v58, %v4634_v36 }
0x11f9   : > { %v4647_v42 = vmul.f32 %v4897_v9, %v4642_v28 }
0x11fb   : > { %v4652_v43 = vadd.f32 %v4898_v41, %v4647_v42 }
0x11fd   : > { %4653 = vst.msk [vmem:[%s330_s10] sm:$0xff] %vm365_vm1, %v4652_v43 }
0x11fe PF: > { %s20_s27 = sadd.s32 1, %s5466_s27  }
0x11ff   : > { %p17_p2 = scmp.ge.s32.totalorder %s20_s27, 4  }
0x1201   :  { %19 = sbr.rel (!%p17_p2) target bundleno = 2 (0x2), region = 105 }
0x1206   :  { %4673 = vsyncpa [#allocation3], 1 }
0x1207   :  { %4675 = vsyncpa [#allocation3 + $0x1], 1 }
0x1208   :  { %4676 = vsyncpa [#allocation5], 1 }

</bundles_post_ra>
